<compile_context>
chip_gen: v6e
topology: v6e:2x2x1
jax: 0.10.0
libtpu: 0.0.40
codegen_flags: <defaults>
</compile_context>

<pallas_src>
import numpy as np
import jax
import jax.numpy as jnp
from jax import lax
from jax.experimental import pallas as pl
from jax.experimental.pallas import tpu as pltpu

_BB = 8  # images per grid step (8 => every per-image row block is one sublane tile)


# ---------------------------------------------------------------------------
# Fused forward kernel (one block of _BB interleaved images per grid step)
# ---------------------------------------------------------------------------
def _cnn_fused_kernel(xw_ref, t1_ref, b1_ref, t2_ref, b2_ref,
                      wf1_ref, bf1_ref, wf2_ref, bf2_ref, out_ref):
    def dot(a, b):
        return jnp.dot(a, b, preferred_element_type=jnp.float32)

    BB = _BB
    t1 = t1_ref[...]                      # (84, 256) conv1 Toeplitz (kh folded)
    b1 = b1_ref[...]                      # (1, 256)
    b2 = b2_ref[...]                      # (1, 256)

    # ---- conv1 + bias + relu: 4 row phases, each one matmul (7*BB, 84)@(84, 256)
    # Output lanes: parity*128 + pw*6 + oc with ow = 2*pw + parity (78 used/parity).
    h = [jnp.maximum(dot(xw_ref[0, q], t1) + b1, 0.0) for q in range(4)]

    # ---- maxpool 2x2 #1: rows = phase-pair max, cols = aligned lane-half max
    p1e = jnp.maximum(h[0], h[1])                       # pooled rows 0,2,...,12
    p1o = jnp.maximum(h[2], h[3])                       # pooled rows 1,3,...,11 (+1 junk)
    p1e = jnp.maximum(p1e[:, 0:128], p1e[:, 128:256])   # (7*BB, 128), lane = pc*6+ic
    p1o = jnp.maximum(p1o[:, 0:128], p1o[:, 128:256])   # (7*BB, 128)

    # ---- conv2 + bias + relu (even / odd output-row blocks) --------------------
    # Output lanes: parity*128 + pwo*16 + oc with ow = 2*pwo + parity (80 used/parity).
    a0 = p1e[0:5 * BB]                                  # pooled rows 0,2,4,6,8
    a1 = p1o[0:5 * BB]                                  # pooled rows 1,3,5,7,9
    a2 = p1e[BB:6 * BB]                                 # pooled rows 2,4,6,8,10
    a3 = p1o[BB:6 * BB]                                 # pooled rows 3,5,7,9,11
    he = dot(a0, t2_ref[0]) + dot(a1, t2_ref[1]) + dot(a2, t2_ref[2])
    ho = dot(a1, t2_ref[0]) + dot(a2, t2_ref[1]) + dot(a3, t2_ref[2])
    he = jnp.maximum(he + b2, 0.0)                      # (5*BB, 256)
    ho = jnp.maximum(ho + b2, 0.0)                      # (5*BB, 256)

    # ---- maxpool 2x2 #2 ---------------------------------------------------------
    p2 = jnp.maximum(he, ho)
    p2 = jnp.maximum(p2[:, 0:128], p2[:, 128:256])      # (5*BB, 128), lane = pcc*16+oc

    # ---- fc1 (flatten folded into 5 accumulated dots) + fc2 ---------------------
    f1 = bf1_ref[...]                                   # (1, 128)
    for prr in range(5):
        f1 = f1 + dot(p2[prr * BB:(prr + 1) * BB], wf1_ref[prr])   # (BB, 128)
    f2 = dot(f1, wf2_ref[...]) + bf2_ref[...]           # (BB, 128); lanes >= 10 are pad
    out_ref[...] = f2.astype(out_ref.dtype)


# ---------------------------------------------------------------------------
# Forward wrapper: one fused pallas_call, grid over batch blocks
# ---------------------------------------------------------------------------
@jax.jit
def cnn_forward(x, packed):
    B = x.shape[0]
    assert x.shape[1:] == (1, 28, 28), x.shape
    BB = _BB
    nblk = -(-B // BB)
    Bpad = nblk * BB

    xs = x.reshape(B, 28, 28)
    if Bpad != B:
        xs = jnp.pad(xs, ((0, Bpad - B), (0, 0), (0, 0)))
    xs = jnp.pad(xs, ((0, 0), (0, 3), (0, 0)))           # rows 28..30 are zeros

    # Per row phase q, pack the 3-row conv window: xw[b, q, r, kh*28+w] = x[b, 4r+q+kh, w]
    phases = []
    for q in range(4):
        wins = [xs[:, q + kh: q + kh + 28: 4, :] for kh in range(3)]   # (Bpad, 7, 28) each
        phases.append(jnp.concatenate(wins, axis=-1))                  # (Bpad, 7, 84)
    xw = jnp.stack(phases, axis=1)                                     # (Bpad, 4, 7, 84)
    # Interleave images along rows: flat row = r*BB + b
    xw = xw.reshape(nblk, BB, 4, 7, 84).transpose(0, 2, 3, 1, 4)
    xw = xw.reshape(nblk, 4, 7 * BB, 84)

    out = pl.pallas_call(
        _cnn_fused_kernel,
        out_shape=jax.ShapeDtypeStruct((Bpad, 128), jnp.float32),
        grid=(nblk,),
        in_specs=[
            pl.BlockSpec((1, 4, 7 * BB, 84), lambda blk: (blk, 0, 0, 0)),  # images
            pl.BlockSpec((84, 256), lambda blk: (0, 0)),          # conv1 Toeplitz
            pl.BlockSpec((1, 256), lambda blk: (0, 0)),           # conv1 bias (padded)
            pl.BlockSpec((3, 128, 256), lambda blk: (0, 0, 0)),   # conv2 Toeplitz
            pl.BlockSpec((1, 256), lambda blk: (0, 0)),           # conv2 bias (padded)
            pl.BlockSpec((5, 128, 128), lambda blk: (0, 0, 0)),   # fc1 weight (permuted)
            pl.BlockSpec((1, 128), lambda blk: (0, 0)),           # fc1 bias
            pl.BlockSpec((128, 128), lambda blk: (0, 0)),         # fc2 weight (T, padded)
            pl.BlockSpec((1, 128), lambda blk: (0, 0)),           # fc2 bias (padded)
        ],
        out_specs=pl.BlockSpec((BB, 128), lambda blk: (blk, 0)),
        compiler_params=pltpu.CompilerParams(
            dimension_semantics=("parallel",)),
    )(xw, packed["t1"], packed["b1"], packed["t2"], packed["b2"],
      packed["wf1"], packed["bf1"], packed["wf2"], packed["bf2"])
    return out[:B, :10]


# ---------------------------------------------------------------------------
# One-time parameter init + packing (Toeplitz conv weights, permuted fc1)
# ---------------------------------------------------------------------------
def init_params(key):
    """PyTorch-style uniform(-1/sqrt(fan_in), 1/sqrt(fan_in)) init."""
    keys = jax.random.split(key, 8)

    def u(k, shape, fan_in):
        bound = 1.0 / np.sqrt(float(fan_in))
        return jax.random.uniform(k, shape, jnp.float32, -bound, bound)

    # NOTE: the PyTorch module also defines self.conv3 = nn.Linear(10, 1) in
    # __init__, but it is never used in forward(), so it is omitted here.
    return dict(
        w1=u(keys[0], (6, 1, 3, 3), 9),    b1=u(keys[1], (6,), 9),
        w2=u(keys[2], (16, 6, 3, 3), 54),  b2=u(keys[3], (16,), 54),
        wf1=u(keys[4], (128, 400), 400),   bf1=u(keys[5], (128,), 400),
        wf2=u(keys[6], (10, 128), 128),    bf2=u(keys[7], (10,), 128),
    )


def pack_params(raw):
    """Pack PyTorch-layout weights into the kernel's matmul-friendly layouts."""
    w1 = np.asarray(raw["w1"]); b1 = np.asarray(raw["b1"])
    w2 = np.asarray(raw["w2"]); b2 = np.asarray(raw["b2"])
    fw1 = np.asarray(raw["wf1"]); fb1 = np.asarray(raw["bf1"])
    fw2 = np.asarray(raw["wf2"]); fb2 = np.asarray(raw["bf2"])

    # conv1 Toeplitz, kh folded into the contraction (84 = 3*28 window cols).
    # out[4r+q, ow, oc] = xwindow[q][r] @ T1, lane L = parity*128 + pw*6 + oc,
    # ow = 2*pw + parity; lanes 78..127 of each parity half are zero padding.
    T1 = np.zeros((84, 256), np.float32)
    B1 = np.zeros((1, 256), np.float32)
    for parity in range(2):
        for pw in range(13):
            ow = 2 * pw + parity
            for oc in range(6):
                l = parity * 128 + pw * 6 + oc
                B1[0, l] = b1[oc]
                for kh in range(3):
                    for kw in range(3):
                        T1[kh * 28 + ow + kw, l] = w1[oc, 0, kh, kw]

    # conv2 Toeplitz: pooled1 rows are 128-lane vectors with lane pc*6 + ic (78 used).
    # out lane L = parity*128 + pwo*16 + oc with ow = 2*pwo + parity (<= 9).
    T2 = np.zeros((3, 128, 256), np.float32)
    B2 = np.zeros((1, 256), np.float32)
    for parity in range(2):
        for pwo in range(5):
            ow = 2 * pwo + parity
            for oc in range(16):
                l = parity * 128 + pwo * 16 + oc
                B2[0, l] = b2[oc]
                for kh in range(3):
                    for kw in range(3):
                        for ic in range(6):
                            T2[kh, (ow + kw) * 6 + ic, l] = w2[oc, ic, kh, kw]

    # fc1: kernel's pooled2 layout is (row=prr, lane=pcc*16+oc); PyTorch flatten
    # order is oc*25 + prr*5 + pcc.  Absorb permutation + 80->128 pad into weight.
    WF1 = np.zeros((5, 128, 128), np.float32)
    for prr in range(5):
        for pcc in range(5):
            for oc in range(16):
                WF1[prr, pcc * 16 + oc, :] = fw1[:, oc * 25 + prr * 5 + pcc]
    BF1 = fb1.reshape(1, 128).astype(np.float32)

    # fc2: transpose + pad 10 -> 128 output lanes so the final store is lane-dense.
    WF2 = np.zeros((128, 128), np.float32); WF2[:, :10] = fw2.T
    BF2 = np.zeros((1, 128), np.float32);   BF2[0, :10] = fb2

    return dict(
        t1=jnp.asarray(T1), b1=jnp.asarray(B1),
        t2=jnp.asarray(T2), b2=jnp.asarray(B2),
        wf1=jnp.asarray(WF1), bf1=jnp.asarray(BF1),
        wf2=jnp.asarray(WF2), bf2=jnp.asarray(BF2),
    )


# ---------------------------------------------------------------------------
# Pure-JAX reference (matches the PyTorch forward) for a sanity check
# ---------------------------------------------------------------------------
def _reference(x, raw):
    hi = lax.Precision.HIGHEST
    dn = ("NCHW", "OIHW", "NCHW")
    y = lax.conv_general_dilated(x, raw["w1"], (1, 1), "VALID",
                                 dimension_numbers=dn, precision=hi)
    y = jax.nn.relu(y + raw["b1"][None, :, None, None])
    y = lax.reduce_window(y, -jnp.inf, lax.max, (1, 1, 2, 2), (1, 1, 2, 2), "VALID")
    y = lax.conv_general_dilated(y, raw["w2"], (1, 1), "VALID",
                                 dimension_numbers=dn, precision=hi)
    y = jax.nn.relu(y + raw["b2"][None, :, None, None])
    y = lax.reduce_window(y, -jnp.inf, lax.max, (1, 1, 2, 2), (1, 1, 2, 2), "VALID")
    y = y.reshape(y.shape[0], -1)
    y = jnp.dot(y, raw["wf1"].T, precision=hi) + raw["bf1"]
    y = jnp.dot(y, raw["wf2"].T, precision=hi) + raw["bf2"]
    return y


if __name__ == "__main__":
    key = jax.random.PRNGKey(0)
    pkey, xkey = jax.random.split(key)
    raw = init_params(pkey)
    packed = pack_params(raw)
    # MNIST-like input: 28 -> conv(3) -> 26 -> pool -> 13 -> conv(3) -> 11 -> pool -> 5
    # so the flatten size is 16 * 5 * 5 = 400, matching nn.Linear(16*25, 128).
    x = jax.random.normal(xkey, (2, 1, 28, 28), jnp.float32)
    out = cnn_forward(x, packed)
    out = jax.block_until_ready(out)
    assert out.shape == (2, 10), out.shape
    ref = jax.block_until_ready(_reference(x, raw))
    # Loose tolerance: MXU matmul passes may differ slightly from HIGHEST-precision XLA.
    np.testing.assert_allclose(np.asarray(out), np.asarray(ref), rtol=5e-2, atol=5e-2)
    print("KERNEL_OK")
</pallas_src>

<mosaic_0001>
module attributes {stable_mosaic.version = 11 : i64} {
  func.func @_cnn_fused_kernel(%arg0: i32, %arg1: memref<1x4x56x84xf32, #tpu.memory_space<vmem>>, %arg2: memref<84x256xf32, #tpu.memory_space<vmem>>, %arg3: memref<1x256xf32, #tpu.memory_space<vmem>>, %arg4: memref<3x128x256xf32, #tpu.memory_space<vmem>>, %arg5: memref<1x256xf32, #tpu.memory_space<vmem>>, %arg6: memref<5x128x128xf32, #tpu.memory_space<vmem>>, %arg7: memref<1x128xf32, #tpu.memory_space<vmem>>, %arg8: memref<128x128xf32, #tpu.memory_space<vmem>>, %arg9: memref<1x128xf32, #tpu.memory_space<vmem>>, %arg10: memref<8x128xf32, #tpu.memory_space<vmem>>) attributes {dimension_semantics = [#tpu.dimension_semantics<parallel>], iteration_bounds = array<i64: 1>, scalar_prefetch = 0 : i64, scratch_operands = 0 : i64, tpu.core_type = #tpu.core_type<tc>, window_params = [{transform_indices = @transform_0, window_bounds = array<i64: 1, 4, 56, 84>}, {pipeline_mode = #tpu.pipeline_mode<synchronous>, transform_indices = @transform_1, window_bounds = array<i64: 84, 256>}, {pipeline_mode = #tpu.pipeline_mode<synchronous>, transform_indices = @transform_2, window_bounds = array<i64: 1, 256>}, {pipeline_mode = #tpu.pipeline_mode<synchronous>, transform_indices = @transform_3, window_bounds = array<i64: 3, 128, 256>}, {pipeline_mode = #tpu.pipeline_mode<synchronous>, transform_indices = @transform_4, window_bounds = array<i64: 1, 256>}, {pipeline_mode = #tpu.pipeline_mode<synchronous>, transform_indices = @transform_5, window_bounds = array<i64: 5, 128, 128>}, {pipeline_mode = #tpu.pipeline_mode<synchronous>, transform_indices = @transform_6, window_bounds = array<i64: 1, 128>}, {pipeline_mode = #tpu.pipeline_mode<synchronous>, transform_indices = @transform_7, window_bounds = array<i64: 128, 128>}, {pipeline_mode = #tpu.pipeline_mode<synchronous>, transform_indices = @transform_8, window_bounds = array<i64: 1, 128>}, {transform_indices = @transform_9, window_bounds = array<i64: 8, 128>}]} {
    %c0 = arith.constant 0 : index
    %c0_0 = arith.constant 0 : index
    %0 = vector.load %arg2[%c0, %c0_0] : memref<84x256xf32, #tpu.memory_space<vmem>>, vector<84x256xf32>
    %c0_1 = arith.constant 0 : index
    %c0_2 = arith.constant 0 : index
    %1 = vector.load %arg3[%c0_1, %c0_2] : memref<1x256xf32, #tpu.memory_space<vmem>>, vector<1x256xf32>
    %c0_3 = arith.constant 0 : index
    %c0_4 = arith.constant 0 : index
    %2 = vector.load %arg5[%c0_3, %c0_4] : memref<1x256xf32, #tpu.memory_space<vmem>>, vector<1x256xf32>
    %c0_5 = arith.constant 0 : index
    %c0_6 = arith.constant 0 : index
    %c0_7 = arith.constant 0 : index
    %c0_8 = arith.constant 0 : index
    %3 = vector.load %arg1[%c0_5, %c0_6, %c0_7, %c0_8] : memref<1x4x56x84xf32, #tpu.memory_space<vmem>>, vector<1x1x56x84xf32>
    %4 = vector.shape_cast %3 : vector<1x1x56x84xf32> to vector<56x84xf32>
    %cst = arith.constant dense<0.000000e+00> : vector<56x256xf32>
    %5 = tpu.matmul %4, %0, %cst {dimension_numbers = #tpu.dot_dimension_numbers<[1], [0], [0], [1], [0, 0, 1, 1], [], []>} : vector<56x84xf32>, vector<84x256xf32>, vector<56x256xf32> -> vector<56x256xf32>
    %6 = vector.broadcast %1 : vector<1x256xf32> to vector<56x256xf32>
    %7 = arith.addf %5, %6 : vector<56x256xf32>
    %cst_9 = arith.constant 0.000000e+00 : f32
    %8 = vector.broadcast %cst_9 : f32 to vector<56x256xf32>
    %9 = arith.maximumf %7, %8 : vector<56x256xf32>
    %c0_10 = arith.constant 0 : index
    %c1 = arith.constant 1 : index
    %c0_11 = arith.constant 0 : index
    %c0_12 = arith.constant 0 : index
    %10 = vector.load %arg1[%c0_10, %c1, %c0_11, %c0_12] : memref<1x4x56x84xf32, #tpu.memory_space<vmem>>, vector<1x1x56x84xf32>
    %11 = vector.shape_cast %10 : vector<1x1x56x84xf32> to vector<56x84xf32>
    %cst_13 = arith.constant dense<0.000000e+00> : vector<56x256xf32>
    %12 = tpu.matmul %11, %0, %cst_13 {dimension_numbers = #tpu.dot_dimension_numbers<[1], [0], [0], [1], [0, 0, 1, 1], [], []>} : vector<56x84xf32>, vector<84x256xf32>, vector<56x256xf32> -> vector<56x256xf32>
    %13 = vector.broadcast %1 : vector<1x256xf32> to vector<56x256xf32>
    %14 = arith.addf %12, %13 : vector<56x256xf32>
    %cst_14 = arith.constant 0.000000e+00 : f32
    %15 = vector.broadcast %cst_14 : f32 to vector<56x256xf32>
    %16 = arith.maximumf %14, %15 : vector<56x256xf32>
    %c0_15 = arith.constant 0 : index
    %c2 = arith.constant 2 : index
    %c0_16 = arith.constant 0 : index
    %c0_17 = arith.constant 0 : index
    %17 = vector.load %arg1[%c0_15, %c2, %c0_16, %c0_17] : memref<1x4x56x84xf32, #tpu.memory_space<vmem>>, vector<1x1x56x84xf32>
    %18 = vector.shape_cast %17 : vector<1x1x56x84xf32> to vector<56x84xf32>
    %cst_18 = arith.constant dense<0.000000e+00> : vector<56x256xf32>
    %19 = tpu.matmul %18, %0, %cst_18 {dimension_numbers = #tpu.dot_dimension_numbers<[1], [0], [0], [1], [0, 0, 1, 1], [], []>} : vector<56x84xf32>, vector<84x256xf32>, vector<56x256xf32> -> vector<56x256xf32>
    %20 = vector.broadcast %1 : vector<1x256xf32> to vector<56x256xf32>
    %21 = arith.addf %19, %20 : vector<56x256xf32>
    %cst_19 = arith.constant 0.000000e+00 : f32
    %22 = vector.broadcast %cst_19 : f32 to vector<56x256xf32>
    %23 = arith.maximumf %21, %22 : vector<56x256xf32>
    %c0_20 = arith.constant 0 : index
    %c3 = arith.constant 3 : index
    %c0_21 = arith.constant 0 : index
    %c0_22 = arith.constant 0 : index
    %24 = vector.load %arg1[%c0_20, %c3, %c0_21, %c0_22] : memref<1x4x56x84xf32, #tpu.memory_space<vmem>>, vector<1x1x56x84xf32>
    %25 = vector.shape_cast %24 : vector<1x1x56x84xf32> to vector<56x84xf32>
    %cst_23 = arith.constant dense<0.000000e+00> : vector<56x256xf32>
    %26 = tpu.matmul %25, %0, %cst_23 {dimension_numbers = #tpu.dot_dimension_numbers<[1], [0], [0], [1], [0, 0, 1, 1], [], []>} : vector<56x84xf32>, vector<84x256xf32>, vector<56x256xf32> -> vector<56x256xf32>
    %27 = vector.broadcast %1 : vector<1x256xf32> to vector<56x256xf32>
    %28 = arith.addf %26, %27 : vector<56x256xf32>
    %cst_24 = arith.constant 0.000000e+00 : f32
    %29 = vector.broadcast %cst_24 : f32 to vector<56x256xf32>
    %30 = arith.maximumf %28, %29 : vector<56x256xf32>
    %31 = arith.maximumf %9, %16 : vector<56x256xf32>
    %32 = arith.maximumf %23, %30 : vector<56x256xf32>
    %33 = vector.extract_strided_slice %31 {offsets = [0, 0], sizes = [56, 128], strides = [1, 1]} : vector<56x256xf32> to vector<56x128xf32>
    %34 = vector.extract_strided_slice %31 {offsets = [0, 128], sizes = [56, 128], strides = [1, 1]} : vector<56x256xf32> to vector<56x128xf32>
    %35 = arith.maximumf %33, %34 : vector<56x128xf32>
    %36 = vector.extract_strided_slice %32 {offsets = [0, 0], sizes = [56, 128], strides = [1, 1]} : vector<56x256xf32> to vector<56x128xf32>
    %37 = vector.extract_strided_slice %32 {offsets = [0, 128], sizes = [56, 128], strides = [1, 1]} : vector<56x256xf32> to vector<56x128xf32>
    %38 = arith.maximumf %36, %37 : vector<56x128xf32>
    %39 = vector.extract_strided_slice %35 {offsets = [0, 0], sizes = [40, 128], strides = [1, 1]} : vector<56x128xf32> to vector<40x128xf32>
    %40 = vector.extract_strided_slice %38 {offsets = [0, 0], sizes = [40, 128], strides = [1, 1]} : vector<56x128xf32> to vector<40x128xf32>
    %41 = vector.extract_strided_slice %35 {offsets = [8, 0], sizes = [40, 128], strides = [1, 1]} : vector<56x128xf32> to vector<40x128xf32>
    %42 = vector.extract_strided_slice %38 {offsets = [8, 0], sizes = [40, 128], strides = [1, 1]} : vector<56x128xf32> to vector<40x128xf32>
    %c0_25 = arith.constant 0 : index
    %c0_26 = arith.constant 0 : index
    %c0_27 = arith.constant 0 : index
    %43 = vector.load %arg4[%c0_25, %c0_26, %c0_27] : memref<3x128x256xf32, #tpu.memory_space<vmem>>, vector<1x128x256xf32>
    %44 = vector.shape_cast %43 : vector<1x128x256xf32> to vector<128x256xf32>
    %cst_28 = arith.constant dense<0.000000e+00> : vector<40x256xf32>
    %45 = tpu.matmul %39, %44, %cst_28 {dimension_numbers = #tpu.dot_dimension_numbers<[1], [0], [0], [1], [0, 0, 1, 1], [], []>} : vector<40x128xf32>, vector<128x256xf32>, vector<40x256xf32> -> vector<40x256xf32>
    %c1_29 = arith.constant 1 : index
    %c0_30 = arith.constant 0 : index
    %c0_31 = arith.constant 0 : index
    %46 = vector.load %arg4[%c1_29, %c0_30, %c0_31] : memref<3x128x256xf32, #tpu.memory_space<vmem>>, vector<1x128x256xf32>
    %47 = vector.shape_cast %46 : vector<1x128x256xf32> to vector<128x256xf32>
    %cst_32 = arith.constant dense<0.000000e+00> : vector<40x256xf32>
    %48 = tpu.matmul %40, %47, %cst_32 {dimension_numbers = #tpu.dot_dimension_numbers<[1], [0], [0], [1], [0, 0, 1, 1], [], []>} : vector<40x128xf32>, vector<128x256xf32>, vector<40x256xf32> -> vector<40x256xf32>
    %49 = arith.addf %45, %48 : vector<40x256xf32>
    %c2_33 = arith.constant 2 : index
    %c0_34 = arith.constant 0 : index
    %c0_35 = arith.constant 0 : index
    %50 = vector.load %arg4[%c2_33, %c0_34, %c0_35] : memref<3x128x256xf32, #tpu.memory_space<vmem>>, vector<1x128x256xf32>
    %51 = vector.shape_cast %50 : vector<1x128x256xf32> to vector<128x256xf32>
    %cst_36 = arith.constant dense<0.000000e+00> : vector<40x256xf32>
    %52 = tpu.matmul %41, %51, %cst_36 {dimension_numbers = #tpu.dot_dimension_numbers<[1], [0], [0], [1], [0, 0, 1, 1], [], []>} : vector<40x128xf32>, vector<128x256xf32>, vector<40x256xf32> -> vector<40x256xf32>
    %53 = arith.addf %49, %52 : vector<40x256xf32>
    %c0_37 = arith.constant 0 : index
    %c0_38 = arith.constant 0 : index
    %c0_39 = arith.constant 0 : index
    %54 = vector.load %arg4[%c0_37, %c0_38, %c0_39] : memref<3x128x256xf32, #tpu.memory_space<vmem>>, vector<1x128x256xf32>
    %55 = vector.shape_cast %54 : vector<1x128x256xf32> to vector<128x256xf32>
    %cst_40 = arith.constant dense<0.000000e+00> : vector<40x256xf32>
    %56 = tpu.matmul %40, %55, %cst_40 {dimension_numbers = #tpu.dot_dimension_numbers<[1], [0], [0], [1], [0, 0, 1, 1], [], []>} : vector<40x128xf32>, vector<128x256xf32>, vector<40x256xf32> -> vector<40x256xf32>
    %c1_41 = arith.constant 1 : index
    %c0_42 = arith.constant 0 : index
    %c0_43 = arith.constant 0 : index
    %57 = vector.load %arg4[%c1_41, %c0_42, %c0_43] : memref<3x128x256xf32, #tpu.memory_space<vmem>>, vector<1x128x256xf32>
    %58 = vector.shape_cast %57 : vector<1x128x256xf32> to vector<128x256xf32>
    %cst_44 = arith.constant dense<0.000000e+00> : vector<40x256xf32>
    %59 = tpu.matmul %41, %58, %cst_44 {dimension_numbers = #tpu.dot_dimension_numbers<[1], [0], [0], [1], [0, 0, 1, 1], [], []>} : vector<40x128xf32>, vector<128x256xf32>, vector<40x256xf32> -> vector<40x256xf32>
    %60 = arith.addf %56, %59 : vector<40x256xf32>
    %c2_45 = arith.constant 2 : index
    %c0_46 = arith.constant 0 : index
    %c0_47 = arith.constant 0 : index
    %61 = vector.load %arg4[%c2_45, %c0_46, %c0_47] : memref<3x128x256xf32, #tpu.memory_space<vmem>>, vector<1x128x256xf32>
    %62 = vector.shape_cast %61 : vector<1x128x256xf32> to vector<128x256xf32>
    %cst_48 = arith.constant dense<0.000000e+00> : vector<40x256xf32>
    %63 = tpu.matmul %42, %62, %cst_48 {dimension_numbers = #tpu.dot_dimension_numbers<[1], [0], [0], [1], [0, 0, 1, 1], [], []>} : vector<40x128xf32>, vector<128x256xf32>, vector<40x256xf32> -> vector<40x256xf32>
    %64 = arith.addf %60, %63 : vector<40x256xf32>
    %65 = vector.broadcast %2 : vector<1x256xf32> to vector<40x256xf32>
    %66 = arith.addf %53, %65 : vector<40x256xf32>
    %cst_49 = arith.constant 0.000000e+00 : f32
    %67 = vector.broadcast %cst_49 : f32 to vector<40x256xf32>
    %68 = arith.maximumf %66, %67 : vector<40x256xf32>
    %69 = vector.broadcast %2 : vector<1x256xf32> to vector<40x256xf32>
    %70 = arith.addf %64, %69 : vector<40x256xf32>
    %cst_50 = arith.constant 0.000000e+00 : f32
    %71 = vector.broadcast %cst_50 : f32 to vector<40x256xf32>
    %72 = arith.maximumf %70, %71 : vector<40x256xf32>
    %73 = arith.maximumf %68, %72 : vector<40x256xf32>
    %74 = vector.extract_strided_slice %73 {offsets = [0, 0], sizes = [40, 128], strides = [1, 1]} : vector<40x256xf32> to vector<40x128xf32>
    %75 = vector.extract_strided_slice %73 {offsets = [0, 128], sizes = [40, 128], strides = [1, 1]} : vector<40x256xf32> to vector<40x128xf32>
    %76 = arith.maximumf %74, %75 : vector<40x128xf32>
    %c0_51 = arith.constant 0 : index
    %c0_52 = arith.constant 0 : index
    %77 = vector.load %arg7[%c0_51, %c0_52] : memref<1x128xf32, #tpu.memory_space<vmem>>, vector<1x128xf32>
    %78 = vector.extract_strided_slice %76 {offsets = [0, 0], sizes = [8, 128], strides = [1, 1]} : vector<40x128xf32> to vector<8x128xf32>
    %c0_53 = arith.constant 0 : index
    %c0_54 = arith.constant 0 : index
    %c0_55 = arith.constant 0 : index
    %79 = vector.load %arg6[%c0_53, %c0_54, %c0_55] : memref<5x128x128xf32, #tpu.memory_space<vmem>>, vector<1x128x128xf32>
    %80 = vector.shape_cast %79 : vector<1x128x128xf32> to vector<128x128xf32>
    %cst_56 = arith.constant dense<0.000000e+00> : vector<8x128xf32>
    %81 = tpu.matmul %78, %80, %cst_56 {dimension_numbers = #tpu.dot_dimension_numbers<[1], [0], [0], [1], [0, 0, 1, 1], [], []>} : vector<8x128xf32>, vector<128x128xf32>, vector<8x128xf32> -> vector<8x128xf32>
    %82 = vector.broadcast %77 : vector<1x128xf32> to vector<8x128xf32>
    %83 = arith.addf %82, %81 : vector<8x128xf32>
    %84 = vector.extract_strided_slice %76 {offsets = [8, 0], sizes = [8, 128], strides = [1, 1]} : vector<40x128xf32> to vector<8x128xf32>
    %c1_57 = arith.constant 1 : index
    %c0_58 = arith.constant 0 : index
    %c0_59 = arith.constant 0 : index
    %85 = vector.load %arg6[%c1_57, %c0_58, %c0_59] : memref<5x128x128xf32, #tpu.memory_space<vmem>>, vector<1x128x128xf32>
    %86 = vector.shape_cast %85 : vector<1x128x128xf32> to vector<128x128xf32>
    %cst_60 = arith.constant dense<0.000000e+00> : vector<8x128xf32>
    %87 = tpu.matmul %84, %86, %cst_60 {dimension_numbers = #tpu.dot_dimension_numbers<[1], [0], [0], [1], [0, 0, 1, 1], [], []>} : vector<8x128xf32>, vector<128x128xf32>, vector<8x128xf32> -> vector<8x128xf32>
    %88 = arith.addf %83, %87 : vector<8x128xf32>
    %89 = vector.extract_strided_slice %76 {offsets = [16, 0], sizes = [8, 128], strides = [1, 1]} : vector<40x128xf32> to vector<8x128xf32>
    %c2_61 = arith.constant 2 : index
    %c0_62 = arith.constant 0 : index
    %c0_63 = arith.constant 0 : index
    %90 = vector.load %arg6[%c2_61, %c0_62, %c0_63] : memref<5x128x128xf32, #tpu.memory_space<vmem>>, vector<1x128x128xf32>
    %91 = vector.shape_cast %90 : vector<1x128x128xf32> to vector<128x128xf32>
    %cst_64 = arith.constant dense<0.000000e+00> : vector<8x128xf32>
    %92 = tpu.matmul %89, %91, %cst_64 {dimension_numbers = #tpu.dot_dimension_numbers<[1], [0], [0], [1], [0, 0, 1, 1], [], []>} : vector<8x128xf32>, vector<128x128xf32>, vector<8x128xf32> -> vector<8x128xf32>
    %93 = arith.addf %88, %92 : vector<8x128xf32>
    %94 = vector.extract_strided_slice %76 {offsets = [24, 0], sizes = [8, 128], strides = [1, 1]} : vector<40x128xf32> to vector<8x128xf32>
    %c3_65 = arith.constant 3 : index
    %c0_66 = arith.constant 0 : index
    %c0_67 = arith.constant 0 : index
    %95 = vector.load %arg6[%c3_65, %c0_66, %c0_67] : memref<5x128x128xf32, #tpu.memory_space<vmem>>, vector<1x128x128xf32>
    %96 = vector.shape_cast %95 : vector<1x128x128xf32> to vector<128x128xf32>
    %cst_68 = arith.constant dense<0.000000e+00> : vector<8x128xf32>
    %97 = tpu.matmul %94, %96, %cst_68 {dimension_numbers = #tpu.dot_dimension_numbers<[1], [0], [0], [1], [0, 0, 1, 1], [], []>} : vector<8x128xf32>, vector<128x128xf32>, vector<8x128xf32> -> vector<8x128xf32>
    %98 = arith.addf %93, %97 : vector<8x128xf32>
    %99 = vector.extract_strided_slice %76 {offsets = [32, 0], sizes = [8, 128], strides = [1, 1]} : vector<40x128xf32> to vector<8x128xf32>
    %c4 = arith.constant 4 : index
    %c0_69 = arith.constant 0 : index
    %c0_70 = arith.constant 0 : index
    %100 = vector.load %arg6[%c4, %c0_69, %c0_70] : memref<5x128x128xf32, #tpu.memory_space<vmem>>, vector<1x128x128xf32>
    %101 = vector.shape_cast %100 : vector<1x128x128xf32> to vector<128x128xf32>
    %cst_71 = arith.constant dense<0.000000e+00> : vector<8x128xf32>
    %102 = tpu.matmul %99, %101, %cst_71 {dimension_numbers = #tpu.dot_dimension_numbers<[1], [0], [0], [1], [0, 0, 1, 1], [], []>} : vector<8x128xf32>, vector<128x128xf32>, vector<8x128xf32> -> vector<8x128xf32>
    %103 = arith.addf %98, %102 : vector<8x128xf32>
    %c0_72 = arith.constant 0 : index
    %c0_73 = arith.constant 0 : index
    %104 = vector.load %arg8[%c0_72, %c0_73] : memref<128x128xf32, #tpu.memory_space<vmem>>, vector<128x128xf32>
    %cst_74 = arith.constant dense<0.000000e+00> : vector<8x128xf32>
    %105 = tpu.matmul %103, %104, %cst_74 {dimension_numbers = #tpu.dot_dimension_numbers<[1], [0], [0], [1], [0, 0, 1, 1], [], []>} : vector<8x128xf32>, vector<128x128xf32>, vector<8x128xf32> -> vector<8x128xf32>
    %c0_75 = arith.constant 0 : index
    %c0_76 = arith.constant 0 : index
    %106 = vector.load %arg9[%c0_75, %c0_76] : memref<1x128xf32, #tpu.memory_space<vmem>>, vector<1x128xf32>
    %107 = vector.broadcast %106 : vector<1x128xf32> to vector<8x128xf32>
    %108 = arith.addf %105, %107 : vector<8x128xf32>
    %c0_77 = arith.constant 0 : index
    %c0_78 = arith.constant 0 : index
    %109 = vector.load %arg10[%c0_77, %c0_78] : memref<8x128xf32, #tpu.memory_space<vmem>>, vector<8x128xf32>
    tpu.vector_store %arg10[%c0_77, %c0_78], %108 {strides = array<i32>} : memref<8x128xf32, #tpu.memory_space<vmem>>, vector<8x128xf32>,
    return
  }
  func.func @transform_0(%arg0: i32) -> (i32, i32, i32, i32) {
    %c0_i32 = arith.constant 0 : i32
    %c0_i32_0 = arith.constant 0 : i32
    %c0_i32_1 = arith.constant 0 : i32
    %c0_i32_2 = arith.constant 0 : i32
    return %arg0, %c0_i32, %c0_i32_0, %c0_i32_1 : i32, i32, i32, i32
  }
  func.func @transform_1(%arg0: i32) -> (i32, i32) {
    %c0_i32 = arith.constant 0 : i32
    %c0_i32_0 = arith.constant 0 : i32
    %c0_i32_1 = arith.constant 0 : i32
    return %c0_i32, %c0_i32_0 : i32, i32
  }
  func.func @transform_2(%arg0: i32) -> (i32, i32) {
    %c0_i32 = arith.constant 0 : i32
    %c0_i32_0 = arith.constant 0 : i32
    %c0_i32_1 = arith.constant 0 : i32
    return %c0_i32, %c0_i32_0 : i32, i32
  }
  func.func @transform_3(%arg0: i32) -> (i32, i32, i32) {
    %c0_i32 = arith.constant 0 : i32
    %c0_i32_0 = arith.constant 0 : i32
    %c0_i32_1 = arith.constant 0 : i32
    %c0_i32_2 = arith.constant 0 : i32
    return %c0_i32, %c0_i32_0, %c0_i32_1 : i32, i32, i32
  }
  func.func @transform_4(%arg0: i32) -> (i32, i32) {
    %c0_i32 = arith.constant 0 : i32
    %c0_i32_0 = arith.constant 0 : i32
    %c0_i32_1 = arith.constant 0 : i32
    return %c0_i32, %c0_i32_0 : i32, i32
  }
  func.func @transform_5(%arg0: i32) -> (i32, i32, i32) {
    %c0_i32 = arith.constant 0 : i32
    %c0_i32_0 = arith.constant 0 : i32
    %c0_i32_1 = arith.constant 0 : i32
    %c0_i32_2 = arith.constant 0 : i32
    return %c0_i32, %c0_i32_0, %c0_i32_1 : i32, i32, i32
  }
  func.func @transform_6(%arg0: i32) -> (i32, i32) {
    %c0_i32 = arith.constant 0 : i32
    %c0_i32_0 = arith.constant 0 : i32
    %c0_i32_1 = arith.constant 0 : i32
    return %c0_i32, %c0_i32_0 : i32, i32
  }
  func.func @transform_7(%arg0: i32) -> (i32, i32) {
    %c0_i32 = arith.constant 0 : i32
    %c0_i32_0 = arith.constant 0 : i32
    %c0_i32_1 = arith.constant 0 : i32
    return %c0_i32, %c0_i32_0 : i32, i32
  }
  func.func @transform_8(%arg0: i32) -> (i32, i32) {
    %c0_i32 = arith.constant 0 : i32
    %c0_i32_0 = arith.constant 0 : i32
    %c0_i32_1 = arith.constant 0 : i32
    return %c0_i32, %c0_i32_0 : i32, i32
  }
  func.func @transform_9(%arg0: i32) -> (i32, i32) {
    %c0_i32 = arith.constant 0 : i32
    %c0_i32_0 = arith.constant 0 : i32
    return %arg0, %c0_i32 : i32, i32
  }
}

</mosaic_0001>

<bundles_post_ra>
// kernel: cnn_forward.1
= control target key start
LH: loop header
LB: loop body
LE: loop exit
PB: predicated region body
PF: predicated region fallthrough
CT: control target
= control target key end

     0   :  { %14 = vsyncpa [#allocation3], 0  ;;  %s4080_s0 = inlined_call_operand.vmem [shape: f32[1,4,56,84], index: 0, kind: input, shape index: {}]   ;;  %s4081_s1 = inlined_call_operand.hbm [shape: f32[84,256], index: 1, kind: input, shape index: {}]   ;;  %s4082_s2 = inlined_call_operand.vmem [shape: f32[1,256], index: 2, kind: input, shape index: {}]   ;;  %s4083_s3 = inlined_call_operand.vmem [shape: f32[3,128,256], index: 3, kind: input, shape index: {}]   ;;  %s4084_s4 = inlined_call_operand.vmem [shape: f32[1,256], index: 4, kind: input, shape index: {}]   ;;  %s4085_s5 = inlined_call_operand.vmem [shape: f32[5,128,128], index: 5, kind: input, shape index: {}]   ;;  %s4086_s6 = inlined_call_operand.vmem [shape: f32[1,128], index: 6, kind: input, shape index: {}]   ;;  %s4087_s7 = inlined_call_operand.hbm [shape: f32[128,128], index: 7, kind: input, shape index: {}]   ;;  %s4088_s8 = inlined_call_operand.vmem [shape: f32[1,128], index: 8, kind: input, shape index: {}]   ;;  %s4089_s9 = inlined_call_operand.vmem [shape: f32[8,128], index: 9, kind: output, shape index: {}]  }
   0x1   :  { %15 = vsyncpa [#allocation5], 0  ;;  %s2575_s30 = smov [#allocation2]  }
   0x2   :  { %s23_s10 = sshll.u32 %s2575_s30, 4  ;;  %s24_s10 = int_to_ptr.vmem [resolvable:$true] %s23_s10 }
   0x3   :  { %s2539_s11 = scalar_lea.vmem %s24_s10, 2816  ;;  %p2544_p1 = scmp.lt.s32.totalorder %s24_s10, %s24_s10 }
   0x4   :  { %p2540_p0 = scmp.ne.s32.totalorder %s24_s10, %s2539_s11  ;;  %p2545_p2 = scmp.lt.s32.totalorder %s2539_s11, %s2539_s11 }
   0x6   :  { %p2546_p3 = por %p2545_p2, %p2544_p1 }
   0x8   :  { %p2547_p4 = pnand %p2546_p3, %p2540_p0 }
   0xa   :  { %2550 = shalt.err (!%p2547_p4)
}
   0xb   :  { %s2576_s12 = smov 256   ;;  %s2577_s13 = smov 16  }
   0xc   :  { %29 = dma.hbm_to_vmem [thread:$0]  %s4081_s1, 2816, %s24_s10, [#allocation3], %s2576_s12, %s2576_s12, %s2577_s13  }
   0xd   :  { %s2578_s16 = smov [#allocation4]  }
   0xe   :  { %s45_s17 = sshll.u32 %s2578_s16, 4  ;;  %s46_s17 = int_to_ptr.vmem [resolvable:$true] %s45_s17 }
   0xf   :  { %s2559_s18 = scalar_lea.vmem %s46_s17, 2048  ;;  %p2564_p6 = scmp.lt.s32.totalorder %s46_s17, %s46_s17 }
  0x10   :  { %p2560_p5 = scmp.ne.s32.totalorder %s46_s17, %s2559_s18  ;;  %p2565_p7 = scmp.lt.s32.totalorder %s2559_s18, %s2559_s18 }
  0x12   :  { %p2566_p8 = por %p2565_p7, %p2564_p6 }
  0x14   :  { %p2567_p9 = pnand %p2566_p8, %p2560_p5 }
  0x16   :  { %2570 = shalt.err (!%p2567_p9)
}
  0x17   :  { %s2579_s19 = smov 128   ;;  %s2580_s20 = smov 8  }
  0x18   :  { %51 = dma.hbm_to_vmem [thread:$0]  %s4087_s7, 2048, %s46_s17, [#allocation5], %s2579_s19, %s2579_s19, %s2580_s20  }
  0x19   :  { %2571 = dma.done.wait [#allocation3], 2816  }
  0x1a   :  { %2572 = vsyncadd [#allocation3], 4294964480 }
  0x1b   :  { %2573 = dma.done.wait [#allocation5], 2048  }
  0x1c   :  { %2574 = vsyncadd [#allocation5], 4294965248  ;;  %v4091_v0 = vmov 0.0   ;;  %vm124_vm0 = vcmask 1043456   ;;  %v2641_v1 = vld [vmem:[#allocation2 + $0xa8] sm:$0xf] }
  0x1d   :  { %195 = vmatprep.mubr.f32.mxu0 %v4091_v0  ;;  %341 = vmatprep.mubr.f32.mxu1 %v4091_v0  ;;  %v2643_v2 = vld [vmem:[#allocation2 + $0xa0] sm:$0xf]  ;;  %v2645_v3 = vld [vmem:[#allocation2 + $0x98] sm:$0xff]  ;;  %v2651_v4 = vld [vmem:[#allocation2 + $0x90] sm:$0xff]  ;;  %vm102_vm1 = vcmask 687104   ;;  %vm2582_vm2 = vmmov 0  }
  0x1e   :  { %2022 = vmatprep.subr.msk.mxu0 %vm124_vm0, %v2641_v1  ;;  %2038 = vmatprep.subr.msk.mxu1 %vm124_vm0, %v2641_v1  ;;  %v2657_v5 = vld [vmem:[#allocation2 + $0x88] sm:$0xff]  ;;  %v2661_v6 = vld [vmem:[#allocation2 + $0x80] sm:$0xff]  ;;  %v2665_v7 = vld [vmem:[#allocation2 + $0x78] sm:$0xff] }
  0x1f   :  { %2023 = vmatpush1.msk.msra.mxu0 %vm124_vm0, %v2643_v2  ;;  %2039 = vmatpush1.msk.msra.mxu1 %vm124_vm0, %v2643_v2  ;;  %v2669_v8 = vld [vmem:[#allocation2 + $0x70] sm:$0xff]  ;;  %v2673_v9 = vld [vmem:[#allocation2 + $0x68] sm:$0xff]  ;;  %v2677_v10 = vld [vmem:[#allocation2 + $0x60] sm:$0xff] }
  0x20   :  { %143 = vmatprep.subr.mxu0 %v2645_v3  ;;  %289 = vmatprep.subr.mxu1 %v2645_v3  ;;  %v2681_v11 = vld [vmem:[#allocation2 + $0x58] sm:$0xff]  ;;  %v2685_v12 = vld [vmem:[#allocation2 + $0x50] sm:$0xff]  ;;  %v2689_v13 = vld [vmem:[#allocation2 + $0x48] sm:$0xff] }
  0x21   :  { %144 = vmatpush1.msra.mxu0 %v2651_v4  ;;  %290 = vmatpush1.msra.mxu1 %v2651_v4  ;;  %v2693_v14 = vld [vmem:[#allocation2 + $0x40] sm:$0xff]  ;;  %v2697_v15 = vld [vmem:[#allocation2 + $0x38] sm:$0xff]  ;;  %v2701_v16 = vld [vmem:[#allocation2 + $0x30] sm:$0xff] }
  0x22   :  { %145 = vmatprep.subr.mxu0 %v2657_v5  ;;  %291 = vmatprep.subr.mxu1 %v2657_v5  ;;  %v2705_v17 = vld [vmem:[#allocation2 + $0x28] sm:$0xff]  ;;  %v2709_v18 = vld [vmem:[#allocation2 + $0x20] sm:$0xff]  ;;  %v2713_v19 = vld [vmem:[#allocation2 + $0x18] sm:$0xff] }
  0x23   :  { %146 = vmatpush1.msra.mxu0 %v2661_v6  ;;  %292 = vmatpush1.msra.mxu1 %v2661_v6  ;;  %v2717_v20 = vld [vmem:[#allocation2 + $0x10] sm:$0xff]  ;;  %v2721_v21 = vld [vmem:[#allocation2 + $0x8] sm:$0xff]  ;;  %v2725_v22 = vld [vmem:[#allocation2] sm:$0xff] }
  0x24   :  { %147 = vmatprep.subr.mxu0 %v2665_v7  ;;  %293 = vmatprep.subr.mxu1 %v2665_v7  ;;  %v84_v23 = vld [vmem:[%s4080_s0] sm:$0xff]  ;;  %v2031_v24 = vld [vmem:[%s4080_s0 + $0x38] sm:$0xff]  ;;  %v85_v25 = vld [vmem:[%s4080_s0 + $0x8] sm:$0xff] }
  0x25   :  { %148 = vmatpush1.msra.mxu0 %v2669_v8  ;;  %294 = vmatpush1.msra.mxu1 %v2669_v8  ;;  %v2032_v26 = vld [vmem:[%s4080_s0 + $0x40] sm:$0xff]  ;;  %v86_v27 = vld [vmem:[%s4080_s0 + $0x10] sm:$0xff]  ;;  %v2033_v28 = vld [vmem:[%s4080_s0 + $0x48] sm:$0xff] }
  0x26   :  { %149 = vmatprep.subr.mxu0 %v2673_v9  ;;  %295 = vmatprep.subr.mxu1 %v2673_v9  ;;  %v87_v29 = vld [vmem:[%s4080_s0 + $0x18] sm:$0xff]  ;;  %v2034_v30 = vld [vmem:[%s4080_s0 + $0x50] sm:$0xff]  ;;  %v88_v31 = vld [vmem:[%s4080_s0 + $0x20] sm:$0xff] }
  0x27   :  { %150 = vmatpush1.msra.mxu0 %v2677_v10  ;;  %296 = vmatpush1.msra.mxu1 %v2677_v10  ;;  %v2035_v32 = vld [vmem:[%s4080_s0 + $0x58] sm:$0xff]  ;;  %v89_v33 = vld [vmem:[%s4080_s0 + $0x28] sm:$0xff]  ;;  %v2036_v34 = vld [vmem:[%s4080_s0 + $0x60] sm:$0xff] }
  0x28   :  { %151 = vmatprep.subr.mxu0 %v2681_v11  ;;  %297 = vmatprep.subr.mxu1 %v2681_v11  ;;  %v90_v35 = vld [vmem:[%s4080_s0 + $0x30] sm:$0xff]  ;;  %v2037_v36 = vld [vmem:[%s4080_s0 + $0x68] sm:$0xff]  ;;  %v753_v39 = vld [vmem:[%s4083_s3 + $0xf8] sm:$0xff] }
  0x29   :  { %152 = vmatpush1.msra.mxu0 %v2685_v12  ;;  %298 = vmatpush1.msra.mxu1 %v2685_v12  ;;  %v2047_v37 = vld [vmem:[%s4080_s0 + $0x70] sm:$0xff]  ;;  %v2063_v38 = vld [vmem:[%s4080_s0 + $0xa8] sm:$0xff]  ;;  %v2048_v41 = vld [vmem:[%s4080_s0 + $0x78] sm:$0xff] }
  0x2a   :  { %153 = vmatprep.subr.mxu0 %v2689_v13  ;;  %299 = vmatprep.subr.mxu1 %v2689_v13  ;;  %v752_v40 = vld [vmem:[%s4083_s3 + $0xf0] sm:$0xff]  ;;  %v2876_v43 = vld [vmem:[%s4083_s3 + $0xe8] sm:$0xff]  ;;  %v2883_v44 = vld [vmem:[%s4083_s3 + $0xe0] sm:$0xff] }
  0x2b   :  { %154 = vmatpush1.msra.mxu0 %v2693_v14  ;;  %300 = vmatpush1.msra.mxu1 %v2693_v14  ;;  %v2064_v42 = vld [vmem:[%s4080_s0 + $0xb0] sm:$0xff]  ;;  %v2049_v45 = vld [vmem:[%s4080_s0 + $0x80] sm:$0xff]  ;;  %v2065_v46 = vld [vmem:[%s4080_s0 + $0xb8] sm:$0xff] }
  0x2c   :  { %155 = vmatprep.subr.mxu0 %v2697_v15  ;;  %301 = vmatprep.subr.mxu1 %v2697_v15  ;;  %v2898_v47 = vld [vmem:[%s4083_s3 + $0xd8] sm:$0xff]  ;;  %v2905_v48 = vld [vmem:[%s4083_s3 + $0xd0] sm:$0xff]  ;;  %v2050_v49 = vld [vmem:[%s4080_s0 + $0x88] sm:$0xff] }
  0x2d   :  { %156 = vmatpush1.msra.mxu0 %v2701_v16  ;;  %302 = vmatpush1.msra.mxu1 %v2701_v16  ;;  %v2066_v50 = vld [vmem:[%s4080_s0 + $0xc0] sm:$0xff]  ;;  %v2920_v51 = vld [vmem:[%s4083_s3 + $0xc8] sm:$0xff]  ;;  %v2051_v53 = vld [vmem:[%s4080_s0 + $0x90] sm:$0xff] }
  0x2e   :  { %157 = vmatprep.subr.mxu0 %v2705_v17  ;;  %303 = vmatprep.subr.mxu1 %v2705_v17  ;;  %v2927_v52 = vld [vmem:[%s4083_s3 + $0xc0] sm:$0xff]  ;;  %v2067_v54 = vld [vmem:[%s4080_s0 + $0xc8] sm:$0xff]  ;;  %v2942_v55 = vld [vmem:[%s4083_s3 + $0xb8] sm:$0xff] }
  0x2f   :  { %158 = vmatpush1.msra.mxu0 %v2709_v18  ;;  %304 = vmatpush1.msra.mxu1 %v2709_v18  ;;  %v2949_v56 = vld [vmem:[%s4083_s3 + $0xb0] sm:$0xff]  ;;  %v2052_v57 = vld [vmem:[%s4080_s0 + $0x98] sm:$0xff]  ;;  %v2963_v59 = vld [vmem:[%s4083_s3 + $0xa8] sm:$0xff] }
  0x30   :  { %159 = vmatprep.subr.mxu0 %v2713_v19  ;;  %305 = vmatprep.subr.mxu1 %v2713_v19  ;;  %v2068_v58 = vld [vmem:[%s4080_s0 + $0xd0] sm:$0xff]  ;;  %4118 = vst [vmem:[#allocation8_spill] sm:$0xff] %v2963_v59  ;;  %v2969_v60 = vld [vmem:[%s4083_s3 + $0xa0] sm:$0xff]  ;;  %v2976_v61 = vld [vmem:[%s4083_s3 + $0x98] sm:$0xff] }
  0x31   :  { %160 = vmatpush1.msra.mxu0 %v2717_v20  ;;  %306 = vmatpush1.msra.mxu1 %v2717_v20  ;;  %4119 = vst [vmem:[#allocation9_spill] sm:$0xff] %v2969_v60  ;;  %4120 = vst [vmem:[#allocation10_spill] sm:$0xff] %v2976_v61  ;;  %v2982_v62 = vld [vmem:[%s4083_s3 + $0x90] sm:$0xff]  ;;  %v2989_v63 = vld [vmem:[%s4083_s3 + $0x88] sm:$0xff] }
  0x32   :  { %161 = vmatprep.subr.mxu0 %v2721_v21  ;;  %307 = vmatprep.subr.mxu1 %v2721_v21  ;;  %4121 = vst [vmem:[#allocation11_spill] sm:$0xff] %v2982_v62  ;;  %4122 = vst [vmem:[#allocation12_spill] sm:$0xff] %v2989_v63 }
  0x33   :  { %162 = vmatpush1.msra.mxu0 %v2725_v22  ;;  %308 = vmatpush1.msra.mxu1 %v2725_v22 }
  0x34   :  { %2024 = vmatmul.mubr.msk.f32.vlgmr.msra.gmra.mxu0 %vm102_vm1, %v84_v23  ;;  %2040 = vmatmul.mubr.msk.f32.vlgmr.msra.gmra.mxu1 %vm102_vm1, %v2031_v24  ;;  %v3125_v23 = vld [vmem:[%s4083_s3 + $0x1d8] sm:$0xff]  ;;  %v3130_v24 = vld [vmem:[%s4083_s3 + $0x1d0] sm:$0xff] }
  0x35   :  { %2054 = vmatprep.subr.msk.mxu0 %vm124_vm0, %v2641_v1  ;;  %2070 = vmatprep.subr.msk.mxu1 %vm124_vm0, %v2641_v1  ;;  %v2996_v1 = vld [vmem:[%s4083_s3 + $0x80] sm:$0xff] }
  0x36   :  { %2055 = vmatpush1.msk.msra.mxu0 %vm124_vm0, %v2643_v2  ;;  %2071 = vmatpush1.msk.msra.mxu1 %vm124_vm0, %v2643_v2  ;;  %4123 = vst [vmem:[#allocation13_spill] sm:$0xff] %v2996_v1  ;;  %v3002_v2 = vld [vmem:[%s4083_s3 + $0x78] sm:$0xff] }
  0x37   :  { %201 = vmatprep.mubr.f32.mxu0 %v4091_v0  ;;  %347 = vmatprep.mubr.f32.mxu1 %v4091_v0  ;;  %4124 = vst [vmem:[#allocation14_spill] sm:$0xff] %v3002_v2 }
  0x38   :  { %435 = vmatprep.subr.mxu0 %v2645_v3  ;;  %581 = vmatprep.subr.mxu1 %v2645_v3  ;;  %v3008_v3 = vld [vmem:[%s4083_s3 + $0x70] sm:$0xff] }
  0x39   :  { %2025 = vmatmul.mubr.msk.f32.gmra.mxu0 %vm102_vm1, %v85_v25  ;;  %2041 = vmatmul.mubr.msk.f32.gmra.mxu1 %vm102_vm1, %v2032_v26  ;;  %4125 = vst [vmem:[#allocation15_spill] sm:$0xff] %v3008_v3  ;;  %v3138_v25 = vld [vmem:[%s4083_s3 + $0x1c8] sm:$0xff]  ;;  %v3144_v26 = vld [vmem:[%s4083_s3 + $0x1c0] sm:$0xff] }
  0x3a   :  { %436 = vmatpush1.msra.mxu0 %v2651_v4  ;;  %582 = vmatpush1.msra.mxu1 %v2651_v4  ;;  %v3014_v4 = vld [vmem:[%s4083_s3 + $0x68] sm:$0xff] }
  0x3b   :  { %437 = vmatprep.subr.mxu0 %v2657_v5  ;;  %583 = vmatprep.subr.mxu1 %v2657_v5  ;;  %4126 = vst [vmem:[#allocation16_spill] sm:$0xff] %v3014_v4  ;;  %v3020_v5 = vld [vmem:[%s4083_s3 + $0x60] sm:$0xff] }
  0x3c   :  { %207 = vmatprep.mubr.f32.mxu0 %v4091_v0  ;;  %353 = vmatprep.mubr.f32.mxu1 %v4091_v0  ;;  %4127 = vst [vmem:[#allocation17_spill] sm:$0xff] %v3020_v5 }
  0x3d   :  { %438 = vmatpush1.msra.mxu0 %v2661_v6  ;;  %584 = vmatpush1.msra.mxu1 %v2661_v6  ;;  %v3026_v6 = vld [vmem:[%s4083_s3 + $0x58] sm:$0xff] }
  0x3e   :  { %2026 = vmatmul.mubr.msk.f32.gmra.mxu0 %vm102_vm1, %v86_v27  ;;  %2042 = vmatmul.mubr.msk.f32.gmra.mxu1 %vm102_vm1, %v2033_v28  ;;  %4128 = vst [vmem:[#allocation18_spill] sm:$0xff] %v3026_v6  ;;  %v3150_v27 = vld [vmem:[%s4083_s3 + $0x1b8] sm:$0xff]  ;;  %v3156_v28 = vld [vmem:[%s4083_s3 + $0x1b0] sm:$0xff] }
  0x3f   :  { %439 = vmatprep.subr.mxu0 %v2665_v7  ;;  %585 = vmatprep.subr.mxu1 %v2665_v7  ;;  %v3032_v7 = vld [vmem:[%s4083_s3 + $0x50] sm:$0xff] }
  0x40   :  { %440 = vmatpush1.msra.mxu0 %v2669_v8  ;;  %586 = vmatpush1.msra.mxu1 %v2669_v8  ;;  %4129 = vst [vmem:[#allocation19_spill] sm:$0xff] %v3032_v7  ;;  %v3040_v8 = vld [vmem:[%s4083_s3 + $0x48] sm:$0xff] }
  0x41   :  { %213 = vmatprep.mubr.f32.mxu0 %v4091_v0  ;;  %359 = vmatprep.mubr.f32.mxu1 %v4091_v0  ;;  %4130 = vst [vmem:[#allocation20_spill] sm:$0xff] %v3040_v8 }
  0x42   :  { %441 = vmatprep.subr.mxu0 %v2673_v9  ;;  %587 = vmatprep.subr.mxu1 %v2673_v9  ;;  %v3045_v9 = vld [vmem:[%s4083_s3 + $0x40] sm:$0xff] }
  0x43   :  { %2027 = vmatmul.mubr.msk.f32.gmra.mxu0 %vm102_vm1, %v87_v29  ;;  %2043 = vmatmul.mubr.msk.f32.gmra.mxu1 %vm102_vm1, %v2034_v30  ;;  %4131 = vst [vmem:[#allocation21_spill] sm:$0xff] %v3045_v9  ;;  %v3162_v29 = vld [vmem:[%s4083_s3 + $0x1a8] sm:$0xff]  ;;  %v3168_v30 = vld [vmem:[%s4083_s3 + $0x1a0] sm:$0xff] }
  0x44   :  { %442 = vmatpush1.msra.mxu0 %v2677_v10  ;;  %588 = vmatpush1.msra.mxu1 %v2677_v10  ;;  %v3052_v10 = vld [vmem:[%s4083_s3 + $0x38] sm:$0xff] }
  0x45   :  { %443 = vmatprep.subr.mxu0 %v2681_v11  ;;  %589 = vmatprep.subr.mxu1 %v2681_v11  ;;  %4132 = vst [vmem:[#allocation22_spill] sm:$0xff] %v3052_v10  ;;  %v3057_v11 = vld [vmem:[%s4083_s3 + $0x30] sm:$0xff] }
  0x46   :  { %444 = vmatpush1.msra.mxu0 %v2685_v12  ;;  %590 = vmatpush1.msra.mxu1 %v2685_v12  ;;  %4133 = vst [vmem:[#allocation23_spill] sm:$0xff] %v3057_v11  ;;  %v3063_v12 = vld [vmem:[%s4083_s3 + $0x28] sm:$0xff] }
  0x47   :  { %219 = vmatprep.mubr.f32.mxu0 %v4091_v0  ;;  %365 = vmatprep.mubr.f32.mxu1 %v4091_v0  ;;  %4134 = vst [vmem:[#allocation24_spill] sm:$0xff] %v3063_v12 }
  0x48   :  { %2028 = vmatmul.mubr.msk.f32.gmra.mxu0 %vm102_vm1, %v88_v31  ;;  %2044 = vmatmul.mubr.msk.f32.gmra.mxu1 %vm102_vm1, %v2035_v32  ;;  %v3174_v31 = vld [vmem:[%s4083_s3 + $0x198] sm:$0xff]  ;;  %v3180_v32 = vld [vmem:[%s4083_s3 + $0x190] sm:$0xff] }
  0x49   :  { %445 = vmatprep.subr.mxu0 %v2689_v13  ;;  %591 = vmatprep.subr.mxu1 %v2689_v13  ;;  %v3068_v13 = vld [vmem:[%s4083_s3 + $0x20] sm:$0xff] }
  0x4a   :  { %446 = vmatpush1.msra.mxu0 %v2693_v14  ;;  %592 = vmatpush1.msra.mxu1 %v2693_v14  ;;  %4135 = vst [vmem:[#allocation25_spill] sm:$0xff] %v3068_v13  ;;  %v2110_v14 = vld [vmem:[%s4083_s3 + $0x1f8] sm:$0xff] }
  0x4b   :  { %447 = vmatprep.subr.mxu0 %v2697_v15  ;;  %593 = vmatprep.subr.mxu1 %v2697_v15  ;;  %v3078_v15 = vld [vmem:[%s4083_s3 + $0x18] sm:$0xff] }
  0x4c   :  { %225 = vmatprep.mubr.f32.mxu0 %v4091_v0  ;;  %371 = vmatprep.mubr.f32.mxu1 %v4091_v0  ;;  %4136 = vst [vmem:[#allocation26_spill] sm:$0xff] %v3078_v15 }
  0x4d   :  { %448 = vmatpush1.msra.mxu0 %v2701_v16  ;;  %594 = vmatpush1.msra.mxu1 %v2701_v16  ;;  %v2069_v16 = vld [vmem:[%s4080_s0 + $0xd8] sm:$0xff] }
  0x4e   :  { %2029 = vmatmul.mubr.msk.f32.gmra.mxu0 %vm102_vm1, %v89_v33  ;;  %2045 = vmatmul.mubr.msk.f32.gmra.mxu1 %vm102_vm1, %v2036_v34  ;;  %v3186_v33 = vld [vmem:[%s4083_s3 + $0x188] sm:$0xff]  ;;  %v3192_v34 = vld [vmem:[%s4083_s3 + $0x180] sm:$0xff] }
  0x4f   :  { %449 = vmatprep.subr.mxu0 %v2705_v17  ;;  %595 = vmatprep.subr.mxu1 %v2705_v17  ;;  %v3087_v17 = vld [vmem:[%s4083_s3 + $0x1f0] sm:$0xff] }
  0x50   :  { %450 = vmatpush1.msra.mxu0 %v2709_v18  ;;  %596 = vmatpush1.msra.mxu1 %v2709_v18  ;;  %v3092_v18 = vld [vmem:[%s4083_s3 + $0x10] sm:$0xff] }
  0x51   :  { %231 = vmatprep.mubr.f32.mxu0 %v4091_v0  ;;  %377 = vmatprep.mubr.f32.mxu1 %v4091_v0  ;;  %4137 = vst [vmem:[#allocation27_spill] sm:$0xff] %v3092_v18 }
  0x52   :  { %451 = vmatprep.subr.mxu0 %v2713_v19  ;;  %597 = vmatprep.subr.mxu1 %v2713_v19  ;;  %v3101_v19 = vld [vmem:[%s4083_s3 + $0x1e8] sm:$0xff] }
  0x53   :  { %2030 = vmatmul.mubr.msk.f32.gmra.mxu0 %vm102_vm1, %v90_v35  ;;  %2046 = vmatmul.mubr.msk.f32.gmra.mxu1 %vm102_vm1, %v2037_v36  ;;  %v3198_v35 = vld [vmem:[%s4083_s3 + $0x178] sm:$0xff]  ;;  %v3204_v36 = vld [vmem:[%s4083_s3 + $0x170] sm:$0xff] }
  0x54   :  { %452 = vmatpush1.msra.mxu0 %v2717_v20  ;;  %598 = vmatpush1.msra.mxu1 %v2717_v20  ;;  %v3106_v20 = vld [vmem:[%s4083_s3 + $0x8] sm:$0xff] }
  0x55   :  { %453 = vmatprep.subr.mxu0 %v2721_v21  ;;  %599 = vmatprep.subr.mxu1 %v2721_v21  ;;  %4138 = vst [vmem:[#allocation28_spill] sm:$0xff] %v3106_v20  ;;  %v3111_v21 = vld [vmem:[%s4083_s3 + $0x1e0] sm:$0xff] }
  0x56   :  { %454 = vmatpush1.msra.mxu0 %v2725_v22  ;;  %487 = vmatprep.mubr.f32.mxu0 %v4091_v0 }
  0x57   :  { %600 = vmatpush1.msra.mxu1 %v2725_v22  ;;  %633 = vmatprep.mubr.f32.mxu1 %v4091_v0  ;;  %v3118_v22 = vld [vmem:[%s4083_s3] sm:$0xff] }
  0x58   :  { %2056 = vmatmul.mubr.msk.f32.vlgmr.msra.gmra.mxu0 %vm102_vm1, %v2047_v37  ;;  %2072 = vmatmul.mubr.msk.f32.vlgmr.msra.gmra.mxu1 %vm102_vm1, %v2063_v38  ;;  %4139 = vst [vmem:[#allocation29_spill] sm:$0xff] %v3118_v22  ;;  %v3210_v37 = vld [vmem:[%s4083_s3 + $0x168] sm:$0xff]  ;;  %v3216_v38 = vld [vmem:[%s4083_s3 + $0x160] sm:$0xff] }
  0x59   :  { %493 = vmatprep.mubr.f32.mxu0 %v4091_v0  ;;  %639 = vmatprep.mubr.f32.mxu1 %v4091_v0 }
  0x5a   :  { %882 = vmatprep.subr.mxu1 %v753_v39  ;;  %787 = vmatprep.subr.mxu0 %v2110_v14  ;;  %v3222_v39 = vld [vmem:[%s4083_s3 + $0x158] sm:$0xff] }
  0x5b   :  { %883 = vmatpush1.msra.mxu1 %v752_v40  ;;  %788 = vmatpush1.msra.mxu0 %v3087_v17  ;;  %v3227_v40 = vld [vmem:[%s4083_s3 + $0x150] sm:$0xff] }
  0x5c   :  { %2057 = vmatmul.mubr.msk.f32.gmra.mxu0 %vm102_vm1, %v2048_v41  ;;  %2073 = vmatmul.mubr.msk.f32.gmra.mxu1 %vm102_vm1, %v2064_v42  ;;  %v3234_v41 = vld [vmem:[%s4083_s3 + $0x148] sm:$0xff]  ;;  %v3240_v42 = vld [vmem:[%s4083_s3 + $0x140] sm:$0xff] }
  0x5d   :  { %499 = vmatprep.mubr.f32.mxu0 %v4091_v0  ;;  %645 = vmatprep.mubr.f32.mxu1 %v4091_v0 }
  0x5e   :  { %884 = vmatprep.subr.mxu1 %v2876_v43  ;;  %789 = vmatprep.subr.mxu0 %v3101_v19 }
  0x5f   :  { %885 = vmatpush1.msra.mxu1 %v2883_v44  ;;  %790 = vmatpush1.msra.mxu0 %v3111_v21 }
  0x60   :  { %2058 = vmatmul.mubr.msk.f32.gmra.mxu0 %vm102_vm1, %v2049_v45  ;;  %2074 = vmatmul.mubr.msk.f32.gmra.mxu1 %vm102_vm1, %v2065_v46  ;;  %v3246_v45 = vld [vmem:[%s4083_s3 + $0x138] sm:$0xff]  ;;  %v3252_v46 = vld [vmem:[%s4083_s3 + $0x130] sm:$0xff] }
  0x61   :  { %505 = vmatprep.mubr.f32.mxu0 %v4091_v0  ;;  %651 = vmatprep.mubr.f32.mxu1 %v4091_v0 }
  0x62   :  { %886 = vmatprep.subr.mxu1 %v2898_v47  ;;  %791 = vmatprep.subr.mxu0 %v3125_v23 }
  0x63   :  { %887 = vmatpush1.msra.mxu1 %v2905_v48  ;;  %792 = vmatpush1.msra.mxu0 %v3130_v24 }
  0x64   :  { %2059 = vmatmul.mubr.msk.f32.gmra.mxu0 %vm102_vm1, %v2050_v49  ;;  %2075 = vmatmul.mubr.msk.f32.gmra.mxu1 %vm102_vm1, %v2066_v50  ;;  %v3258_v49 = vld [vmem:[%s4083_s3 + $0x128] sm:$0xff]  ;;  %v3264_v50 = vld [vmem:[%s4083_s3 + $0x120] sm:$0xff] }
  0x65   :  { %511 = vmatprep.mubr.f32.mxu0 %v4091_v0  ;;  %657 = vmatprep.mubr.f32.mxu1 %v4091_v0 }
  0x66   :  { %888 = vmatprep.subr.mxu1 %v2920_v51  ;;  %793 = vmatprep.subr.mxu0 %v3138_v25 }
  0x67   :  { %889 = vmatpush1.msra.mxu1 %v2927_v52  ;;  %794 = vmatpush1.msra.mxu0 %v3144_v26 }
  0x68   :  { %2060 = vmatmul.mubr.msk.f32.gmra.mxu0 %vm102_vm1, %v2051_v53  ;;  %2076 = vmatmul.mubr.msk.f32.gmra.mxu1 %vm102_vm1, %v2067_v54  ;;  %v2053_v53 = vld [vmem:[%s4080_s0 + $0xa0] sm:$0xff]  ;;  %v3273_v54 = vld [vmem:[%s4083_s3 + $0x118] sm:$0xff] }
  0x69   :  { %517 = vmatprep.mubr.f32.mxu0 %v4091_v0  ;;  %663 = vmatprep.mubr.f32.mxu1 %v4091_v0 }
  0x6a   :  { %890 = vmatprep.subr.mxu1 %v2942_v55  ;;  %795 = vmatprep.subr.mxu0 %v3150_v27 }
  0x6b   :  { %891 = vmatpush1.msra.mxu1 %v2949_v56  ;;  %796 = vmatpush1.msra.mxu0 %v3156_v28 }
  0x6c   :  { %2061 = vmatmul.mubr.msk.f32.gmra.mxu0 %vm102_vm1, %v2052_v57  ;;  %2077 = vmatmul.mubr.msk.f32.gmra.mxu1 %vm102_vm1, %v2068_v58  ;;  %v3280_v57 = vld [vmem:[%s4083_s3 + $0x110] sm:$0xff]  ;;  %v3286_v58 = vld [vmem:[%s4083_s3 + $0x108] sm:$0xff] }
  0x6d   :  { %892 = vmatprep.subr.mxu1 %v2963_v59  ;;  %669 = vmatprep.mubr.f32.mxu1 %v4091_v0 }
  0x6e   :  { %893 = vmatpush1.msra.mxu1 %v2969_v60  ;;  %523 = vmatprep.mubr.f32.mxu0 %v4091_v0 }
  0x6f   :  { %894 = vmatprep.subr.mxu1 %v2976_v61  ;;  %797 = vmatprep.subr.mxu0 %v3162_v29 }
  0x70   :  { %895 = vmatpush1.msra.mxu1 %v2982_v62  ;;  %798 = vmatpush1.msra.mxu0 %v3168_v30 }
  0x71   :  { %896 = vmatprep.subr.mxu1 %v2989_v63  ;;  %2078 = vmatmul.mubr.msk.f32.gmra.mxu1 %vm102_vm1, %v2069_v16  ;;  %v3299_v16 = vld [vmem:[%s4083_s3 + $0x2f8] sm:$0xff] }
  0x72   :  { %897 = vmatpush1.msra.mxu1 %v2996_v1  ;;  %946 = vmatprep.mubr.f32.mxu1 %v4091_v0 }
  0x73   :  { %898 = vmatprep.subr.mxu1 %v3002_v2  ;;  %799 = vmatprep.subr.mxu0 %v3174_v31 }
  0x74   :  { %899 = vmatpush1.msra.mxu1 %v3008_v3  ;;  %800 = vmatpush1.msra.mxu0 %v3180_v32 }
  0x75   :  { %900 = vmatprep.subr.mxu1 %v3014_v4  ;;  %801 = vmatprep.subr.mxu0 %v3186_v33 }
  0x76   :  { %901 = vmatpush1.msra.mxu1 %v3020_v5  ;;  %802 = vmatpush1.msra.mxu0 %v3192_v34 }
  0x77   :  { %902 = vmatprep.subr.mxu1 %v3026_v6  ;;  %803 = vmatprep.subr.mxu0 %v3198_v35 }
  0x78   :  { %903 = vmatpush1.msra.mxu1 %v3032_v7  ;;  %804 = vmatpush1.msra.mxu0 %v3204_v36 }
  0x79   :  { %904 = vmatprep.subr.mxu1 %v3040_v8  ;;  %805 = vmatprep.subr.mxu0 %v3210_v37 }
  0x7a   :  { %905 = vmatpush1.msra.mxu1 %v3045_v9  ;;  %806 = vmatpush1.msra.mxu0 %v3216_v38 }
  0x7b   :  { %906 = vmatprep.subr.mxu1 %v3052_v10  ;;  %807 = vmatprep.subr.mxu0 %v3222_v39 }
  0x7c   :  { %907 = vmatpush1.msra.mxu1 %v3057_v11  ;;  %808 = vmatpush1.msra.mxu0 %v3227_v40 }
  0x7d   :  { %908 = vmatprep.subr.mxu1 %v3063_v12  ;;  %809 = vmatprep.subr.mxu0 %v3234_v41 }
  0x7e   :  { %909 = vmatpush1.msra.mxu1 %v3068_v13  ;;  %810 = vmatpush1.msra.mxu0 %v3240_v42 }
  0x7f   :  { %910 = vmatprep.subr.mxu1 %v3078_v15  ;;  %811 = vmatprep.subr.mxu0 %v3246_v45 }
  0x80   :  { %911 = vmatpush1.msra.mxu1 %v3092_v18  ;;  %812 = vmatpush1.msra.mxu0 %v3252_v46 }
  0x81   :  { %912 = vmatprep.subr.mxu1 %v3106_v20  ;;  %813 = vmatprep.subr.mxu0 %v3258_v49  ;;  %v82_v20 = vld [vmem:[%s4082_s2] sm:$0x3] }
  0x82   :  { %913 = vmatpush1.msra.mxu1 %v3118_v22  ;;  %814 = vmatpush1.msra.mxu0 %v3264_v50 }
  0x83   :  { %1115 = vmatprep.subr.mxu1 %v2110_v14  ;;  %2062 = vmatmul.mubr.msk.f32.gmra.mxu0 %vm102_vm1, %v2053_v53  ;;  %v3293_v14 = vld [vmem:[%s4083_s3 + $0x100] sm:$0xff]  ;;  %v92_v53 = vlaneseq }
  0x84   :  { %815 = vmatprep.subr.mxu0 %v3273_v54  ;;  %851 = vmatprep.mubr.f32.mxu0 %v4091_v0 }
  0x85   :  { %816 = vmatpush1.msra.mxu0 %v3280_v57  ;;  %v3302_v22 = vshrl.u32 %v92_v53, 7 }
  0x86   :  { %817 = vmatprep.subr.mxu0 %v3286_v58 }
  0x87   :  { %818 = vmatpush1.msra.mxu0 %v3293_v14  ;;  %4140 = vst [vmem:[#allocation30_spill] sm:$0xff] %v3302_v22  ;;  %v4106_v0 = vsub.s32 0, %v3302_v22  ;;  %v4111_v18 = vsub.s32 1, %v3302_v22 }
  0x88   :  { %1010 = vmatprep.subr.mxu0 %v3299_v16 }
  0x89   :  { %v3311_v15 = vrot.slane %v82_v20, %v4106_v0  ;;  %v3315_v13 = vrot.slane %v82_v20, %v4111_v18 }
  0xf4   :  { %v197_v12 = vpop.f32.mrf.mxu0  ;;  %v343_v11 = vpop.f32.mrf.mxu1 }
  0xf5   :  { %v198_v53 = vadd.f32 %v197_v12, %v3311_v15  ;;  %v344_v10 = vadd.f32 %v343_v11, %v3311_v15 }
  0xf6   :  { %v199_v9 = vpop.f32.mrf.mxu0  ;;  %v345_v8 = vpop.f32.mrf.mxu1 }
  0xf7   :  { %v236_v7 = vmax.f32 %v198_v53, 0.0  ;;  %v382_v6 = vmax.f32 %v344_v10, 0.0  ;;  %v200_v5 = vadd.f32 %v199_v9, %v3315_v13  ;;  %v346_v4 = vadd.f32 %v345_v8, %v3315_v13 }
  0xf9   :  { %v237_v0 = vmax.f32 %v200_v5, 0.0  ;;  %v383_v3 = vmax.f32 %v346_v4, 0.0  ;;  %v203_v2 = vpop.f32.mrf.mxu0  ;;  %v349_v22 = vpop.f32.mrf.mxu1  ;;  %v686_v1 = vmax.f32 %v236_v7, %v382_v6 }
  0xfa   :  { %v204_v20 = vadd.f32 %v203_v2, %v3311_v15  ;;  %v350_v18 = vadd.f32 %v349_v22, %v3311_v15 }
  0xfb   :  { %v687_v12 = vmax.f32 %v237_v0, %v383_v3  ;;  %v205_v63 = vpop.f32.mrf.mxu0  ;;  %v351_v11 = vpop.f32.mrf.mxu1 }
  0xfc   :  { %v238_v62 = vmax.f32 %v204_v20, 0.0  ;;  %v384_v61 = vmax.f32 %v350_v18, 0.0  ;;  %v206_v10 = vadd.f32 %v205_v63, %v3315_v13  ;;  %v352_v9 = vadd.f32 %v351_v11, %v3315_v13 }
  0xfd   :  { %v710_v53 = vmax.f32 %v686_v1, %v687_v12  ;;  %v4141_v18 = vmov 0.0  }
  0xfe   :  { %v239_v8 = vmax.f32 %v206_v10, 0.0  ;;  %v385_v5 = vmax.f32 %v352_v9, 0.0  ;;  %v209_v4 = vpop.f32.mrf.mxu0  ;;  %v355_v60 = vpop.f32.mrf.mxu1  ;;  %v688_v6 = vmax.f32 %v238_v62, %v384_v61 }
  0xff   :  { %v210_v59 = vadd.f32 %v209_v4, %v3311_v15  ;;  %v356_v2 = vadd.f32 %v355_v60, %v3311_v15  ;;  %947 = vmatmul.mubr.f32.vlgmr.msra.gmra.mxu1 %v710_v53 }
 0x100   :  { %v689_v0 = vmax.f32 %v239_v8, %v385_v5  ;;  %v211_v3 = vpop.f32.mrf.mxu0  ;;  %v357_v7 = vpop.f32.mrf.mxu1  ;;  %1116 = vmatpush1.msra.mxu1 %v3087_v17  ;;  %952 = vmatprep.mubr.f32.mxu1 %v4141_v18 }
 0x101   :  { %v240_v63 = vmax.f32 %v210_v59, 0.0  ;;  %v386_v22 = vmax.f32 %v356_v2, 0.0  ;;  %v212_v1 = vadd.f32 %v211_v3, %v3315_v13  ;;  %v358_v20 = vadd.f32 %v357_v7, %v3315_v13  ;;  %1117 = vmatprep.subr.mxu1 %v3101_v19 }
 0x102   :  { %1118 = vmatpush1.msra.mxu1 %v3111_v21  ;;  %v3333_v60 = vmax.f32 %v688_v6, %v689_v0 }
 0x103   :  { %v241_v61 = vmax.f32 %v212_v1, 0.0  ;;  %v387_v62 = vmax.f32 %v358_v20, 0.0  ;;  %v215_v12 = vpop.f32.mrf.mxu0  ;;  %v361_v11 = vpop.f32.mrf.mxu1  ;;  %1119 = vmatprep.subr.mxu1 %v3125_v23  ;;  %v690_v10 = vmax.f32 %v240_v63, %v386_v22 }
 0x104   :  { %v216_v17 = vadd.f32 %v215_v12, %v3311_v15  ;;  %v362_v59 = vadd.f32 %v361_v11, %v3311_v15  ;;  %953 = vmatmul.mubr.f32.gmra.mxu1 %v3333_v60 }
 0x105   :  { %v691_v9 = vmax.f32 %v241_v61, %v387_v62  ;;  %v217_v53 = vpop.f32.mrf.mxu0  ;;  %v363_v19 = vpop.f32.mrf.mxu1  ;;  %1120 = vmatpush1.msra.mxu1 %v3130_v24  ;;  %958 = vmatprep.mubr.f32.mxu1 %v4141_v18 }
 0x106   :  { %v242_v21 = vmax.f32 %v216_v17, 0.0  ;;  %v388_v8 = vmax.f32 %v362_v59, 0.0  ;;  %v218_v5 = vadd.f32 %v217_v53, %v3315_v13  ;;  %v364_v23 = vadd.f32 %v363_v19, %v3315_v13  ;;  %1121 = vmatprep.subr.mxu1 %v3138_v25 }
 0x107   :  { %1122 = vmatpush1.msra.mxu1 %v3144_v26  ;;  %v3345_v4 = vmax.f32 %v690_v10, %v691_v9 }
 0x108   :  { %v243_v2 = vmax.f32 %v218_v5, 0.0  ;;  %v389_v6 = vmax.f32 %v364_v23, 0.0  ;;  %v221_v0 = vpop.f32.mrf.mxu0  ;;  %v367_v3 = vpop.f32.mrf.mxu1  ;;  %1123 = vmatprep.subr.mxu1 %v3150_v27  ;;  %v692_v63 = vmax.f32 %v242_v21, %v388_v8 }
 0x109   :  { %v222_v24 = vadd.f32 %v221_v0, %v3311_v15  ;;  %v368_v7 = vadd.f32 %v367_v3, %v3311_v15  ;;  %959 = vmatmul.mubr.f32.gmra.mxu1 %v3345_v4 }
 0x10a   :  { %v693_v22 = vmax.f32 %v243_v2, %v389_v6  ;;  %v223_v1 = vpop.f32.mrf.mxu0  ;;  %v369_v25 = vpop.f32.mrf.mxu1  ;;  %1124 = vmatpush1.msra.mxu1 %v3156_v28  ;;  %964 = vmatprep.mubr.f32.mxu1 %v4141_v18 }
 0x10b   :  { %v224_v26 = vadd.f32 %v223_v1, %v3315_v13  ;;  %v370_v20 = vadd.f32 %v369_v25, %v3315_v13  ;;  %1125 = vmatprep.subr.mxu1 %v3162_v29  ;;  %v244_v27 = vmax.f32 %v222_v24, 0.0  ;;  %v390_v61 = vmax.f32 %v368_v7, 0.0 }
 0x10c   :  { %1126 = vmatpush1.msra.mxu1 %v3168_v30  ;;  %v3357_v62 = vmax.f32 %v692_v63, %v693_v22 }
 0x10d   :  { %v245_v12 = vmax.f32 %v224_v26, 0.0  ;;  %v391_v11 = vmax.f32 %v370_v20, 0.0  ;;  %1127 = vmatprep.subr.mxu1 %v3174_v31  ;;  %v694_v29 = vmax.f32 %v244_v27, %v390_v61 }
 0x10e   :  { %v3360_v17 = vpop.f32.mrf.mxu0  ;;  %v3362_v28 = vpop.f32.mrf.mxu1  ;;  %965 = vmatmul.mubr.f32.gmra.mxu1 %v3357_v62 }
 0x10f   :  { %v695_v59 = vmax.f32 %v245_v12, %v391_v11  ;;  %1128 = vmatpush1.msra.mxu1 %v3180_v32  ;;  %970 = vmatprep.mubr.f32.mxu1 %v4141_v18 }
 0x110   :  { %v3367_v10 = vpop.f32.mrf.mxu0  ;;  %v3369_v30 = vpop.f32.mrf.mxu1  ;;  %1129 = vmatprep.subr.mxu1 %v3186_v33 }
 0x111   :  { %1130 = vmatpush1.msra.mxu1 %v3192_v34  ;;  %v3374_v31 = vmax.f32 %v694_v29, %v695_v59 }
 0x112   :  { %1131 = vmatprep.subr.mxu1 %v3198_v35 }
 0x113   :  { %v233_v9 = vpop.f32.mrf.mxu0  ;;  %v379_v53 = vpop.f32.mrf.mxu1  ;;  %1132 = vmatpush1.msra.mxu1 %v3204_v36 }
 0x114   :  { %971 = vmatmul.mubr.f32.gmra.mxu1 %v3374_v31  ;;  %1133 = vmatprep.subr.mxu1 %v3210_v37 }
 0x115   :  { %v234_v32 = vpop.f32.mrf.mxu0  ;;  %v380_v19 = vpop.f32.mrf.mxu1  ;;  %1134 = vmatpush1.msra.mxu1 %v3216_v38  ;;  %1179 = vmatprep.mubr.f32.mxu1 %v4141_v18 }
 0x116   :  { %1135 = vmatprep.subr.mxu1 %v3222_v39 }
 0x117   :  { %1136 = vmatpush1.msra.mxu1 %v3227_v40 }
 0x118   :  { %v489_v33 = vpop.f32.mrf.mxu0  ;;  %v635_v34 = vpop.f32.mrf.mxu1  ;;  %1137 = vmatprep.subr.mxu1 %v3234_v41 }
 0x119   :  { %v490_v35 = vadd.f32 %v489_v33, %v3311_v15  ;;  %v636_v36 = vadd.f32 %v635_v34, %v3311_v15  ;;  %1138 = vmatpush1.msra.mxu1 %v3240_v42 }
 0x11a   :  { %v491_v37 = vpop.f32.mrf.mxu0  ;;  %v637_v21 = vpop.f32.mrf.mxu1  ;;  %1139 = vmatprep.subr.mxu1 %v3246_v45 }
 0x11b   :  { %v528_v38 = vmax.f32 %v490_v35, 0.0  ;;  %v674_v8 = vmax.f32 %v636_v36, 0.0  ;;  %v492_v39 = vadd.f32 %v491_v37, %v3315_v13  ;;  %v638_v40 = vadd.f32 %v637_v21, %v3315_v13  ;;  %1140 = vmatpush1.msra.mxu1 %v3252_v46 }
 0x11c   :  { %v495_v5 = vpop.f32.mrf.mxu0  ;;  %v641_v41 = vpop.f32.mrf.mxu1  ;;  %1141 = vmatprep.subr.mxu1 %v3258_v49 }
 0x11d   :  { %v529_v23 = vmax.f32 %v492_v39, 0.0  ;;  %v675_v2 = vmax.f32 %v638_v40, 0.0  ;;  %v496_v42 = vadd.f32 %v495_v5, %v3311_v15  ;;  %1142 = vmatpush1.msra.mxu1 %v3264_v50  ;;  %v698_v6 = vmax.f32 %v528_v38, %v674_v8  ;;  %v2137_v39 = vld [vmem:[%s4083_s3 + $0x2d0] sm:$0xff] }
 0x11e   :  { %v642_v45 = vadd.f32 %v641_v41, %v3311_v15  ;;  %v497_v0 = vpop.f32.mrf.mxu0  ;;  %v643_v3 = vpop.f32.mrf.mxu1  ;;  %1143 = vmatprep.subr.mxu1 %v3273_v54  ;;  %v2141_v54 = vld [vmem:[%s4083_s3 + $0x2f0] sm:$0xff] }
 0x11f   :  { %v699_v24 = vmax.f32 %v529_v23, %v675_v2  ;;  %v530_v7 = vmax.f32 %v496_v42, 0.0  ;;  %v498_v46 = vadd.f32 %v497_v0, %v3315_v13  ;;  %v644_v63 = vadd.f32 %v643_v3, %v3315_v13  ;;  %1144 = vmatpush1.msra.mxu1 %v3280_v57  ;;  %v2136_v2 = vld [vmem:[%s4083_s3 + $0x2c8] sm:$0xff]  ;;  %v2135_v0 = vld [vmem:[%s4083_s3 + $0x2c0] sm:$0xff] }
 0x120   :  { %v676_v49 = vmax.f32 %v642_v45, 0.0  ;;  %v501_v22 = vpop.f32.mrf.mxu0  ;;  %v647_v1 = vpop.f32.mrf.mxu1  ;;  %1145 = vmatprep.subr.mxu1 %v3286_v58  ;;  %v2140_v58 = vld [vmem:[%s4083_s3 + $0x2e8] sm:$0xff] }
 0x121   :  { %v3400_v50 = vmax.f32 %v698_v6, %v699_v24  ;;  %v531_v25 = vmax.f32 %v498_v46, 0.0  ;;  %v677_v26 = vmax.f32 %v644_v63, 0.0  ;;  %v502_v20 = vadd.f32 %v501_v22, %v3311_v15  ;;  %1146 = vmatpush1.msra.mxu1 %v3293_v14  ;;  %v2139_v14 = vld [vmem:[%s4083_s3 + $0x2e0] sm:$0xff]  ;;  %v2134_v46 = vld [vmem:[%s4083_s3 + $0x2b8] sm:$0xff] }
 0x122   :  { %v700_v27 = vmax.f32 %v530_v7, %v676_v49  ;;  %v648_v57 = vadd.f32 %v647_v1, %v3311_v15  ;;  %v503_v61 = vpop.f32.mrf.mxu0  ;;  %v649_v12 = vpop.f32.mrf.mxu1  ;;  %1180 = vmatmul.mubr.f32.vlgmr.msra.gmra.mxu1 %v3333_v60  ;;  %1305 = vmatprep.subr.mxu1 %v3299_v16  ;;  %v2138_v16 = vld [vmem:[%s4083_s3 + $0x2d8] sm:$0xff] }
 0x123   :  { %v701_v11 = vmax.f32 %v531_v25, %v677_v26  ;;  %v532_v59 = vmax.f32 %v502_v20, 0.0  ;;  %v504_v29 = vadd.f32 %v503_v61, %v3315_v13  ;;  %v650_v9 = vadd.f32 %v649_v12, %v3315_v13  ;;  %852 = vmatmul.mubr.f32.vlgmr.msra.gmra.mxu0 %v3400_v50  ;;  %1306 = vmatpush1.msra.mxu1 %v2141_v54  ;;  %v2133_v26 = vld [vmem:[%s4083_s3 + $0x2b0] sm:$0xff] }
 0x124   :  { %v678_v53 = vmax.f32 %v648_v57, 0.0  ;;  %1011 = vmatpush1.msra.mxu0 %v2141_v54  ;;  %v507_v32 = vpop.f32.mrf.mxu0  ;;  %v653_v19 = vpop.f32.mrf.mxu1  ;;  %857 = vmatprep.mubr.f32.mxu0 %v4141_v18 }
 0x125   :  { %v533_v33 = vmax.f32 %v504_v29, 0.0  ;;  %v679_v34 = vmax.f32 %v650_v9, 0.0  ;;  %v508_v35 = vadd.f32 %v507_v32, %v3311_v15  ;;  %v654_v36 = vadd.f32 %v653_v19, %v3311_v15  ;;  %1012 = vmatprep.subr.mxu0 %v2140_v58  ;;  %1307 = vmatprep.subr.mxu1 %v2140_v58  ;;  %v2131_v58 = vld [vmem:[%s4083_s3 + $0x2a0] sm:$0xff] }
 0x126   :  { %v702_v37 = vmax.f32 %v532_v59, %v678_v53  ;;  %1013 = vmatpush1.msra.mxu0 %v2139_v14  ;;  %v509_v21 = vpop.f32.mrf.mxu0  ;;  %v655_v38 = vpop.f32.mrf.mxu1  ;;  %v3425_v8 = vmax.f32 %v700_v27, %v701_v11  ;;  %1185 = vmatprep.mubr.f32.mxu1 %v4141_v18  ;;  %v2132_v27 = vld [vmem:[%s4083_s3 + $0x2a8] sm:$0xff]  ;;  %v230_v29 = vadd.f32 %v3367_v10, %v3315_v13  ;;  %v2130_v53 = vld [vmem:[%s4083_s3 + $0x298] sm:$0xff] }
 0x127   :  { %v703_v40 = vmax.f32 %v533_v33, %v679_v34  ;;  %v534_v5 = vmax.f32 %v508_v35, 0.0  ;;  %v680_v41 = vmax.f32 %v654_v36, 0.0  ;;  %v510_v23 = vadd.f32 %v509_v21, %v3315_v13  ;;  %1014 = vmatprep.subr.mxu0 %v2138_v16  ;;  %1308 = vmatpush1.msra.mxu1 %v2139_v14 }
 0x128   :  { %v656_v42 = vadd.f32 %v655_v38, %v3315_v13  ;;  %858 = vmatmul.mubr.f32.gmra.mxu0 %v3425_v8  ;;  %v513_v6 = vpop.f32.mrf.mxu0  ;;  %v659_v45 = vpop.f32.mrf.mxu1  ;;  %1186 = vmatmul.mubr.f32.gmra.mxu1 %v3345_v4  ;;  %v376_v19 = vadd.f32 %v3369_v30, %v3315_v13  ;;  %v228_v35 = vadd.f32 %v3360_v17, %v3311_v15 }
 0x129   :  { %v535_v3 = vmax.f32 %v510_v23, 0.0  ;;  %1015 = vmatpush1.msra.mxu0 %v2137_v39  ;;  %v514_v24 = vadd.f32 %v513_v6, %v3311_v15  ;;  %v660_v7 = vadd.f32 %v659_v45, %v3311_v15  ;;  %863 = vmatprep.mubr.f32.mxu0 %v4141_v18  ;;  %v704_v63 = vmax.f32 %v534_v5, %v680_v41  ;;  %v2127_v23 = vld [vmem:[%s4083_s3 + $0x280] sm:$0xff] }
 0x12a   :  { %v681_v49 = vmax.f32 %v656_v42, 0.0  ;;  %1016 = vmatprep.subr.mxu0 %v2136_v2  ;;  %v515_v22 = vpop.f32.mrf.mxu0  ;;  %v661_v1 = vpop.f32.mrf.mxu1  ;;  %1309 = vmatprep.subr.mxu1 %v2138_v16  ;;  %v3447_v25 = vmax.f32 %v702_v37, %v703_v40  ;;  %v374_v30 = vadd.f32 %v3362_v28, %v3311_v15  ;;  %v2129_v40 = vld [vmem:[%s4083_s3 + $0x290] sm:$0xff]  ;;  %v393_v28 = vmax.f32 %v376_v19, 0.0  ;;  %v2126_v42 = vld [vmem:[%s4083_s3 + $0x278] sm:$0xff] }
 0x12b   :  { %1017 = vmatpush1.msra.mxu0 %v2135_v0  ;;  %v516_v20 = vadd.f32 %v515_v22, %v3315_v13  ;;  %v662_v54 = vadd.f32 %v661_v1, %v3315_v13  ;;  %1310 = vmatpush1.msra.mxu1 %v2137_v39  ;;  %v536_v61 = vmax.f32 %v514_v24, 0.0  ;;  %v682_v12 = vmax.f32 %v660_v7, 0.0  ;;  %v2123_v22 = vld [vmem:[%s4083_s3 + $0x260] sm:$0xff]  ;;  %v2122_v1 = vld [vmem:[%s4083_s3 + $0x258] sm:$0xff]  ;;  %v2530_v19 = vld [vmem:[%s4083_s3 + $0xf0] sm:$0xff] }
 0x12c   :  { %v705_v57 = vmax.f32 %v535_v3, %v681_v49  ;;  %1018 = vmatprep.subr.mxu0 %v2134_v46  ;;  %864 = vmatmul.mubr.f32.gmra.mxu0 %v3447_v25  ;;  %v519_v11 = vpop.f32.mrf.mxu0  ;;  %v665_v59 = vpop.f32.mrf.mxu1  ;;  %v246_v45 = vmax.f32 %v228_v35, 0.0  ;;  %v4155_v35 = vld [vmem:[#allocation21_spill] sm:$0xff] }
 0x12d   :  { %v537_v9 = vmax.f32 %v516_v20, 0.0  ;;  %v683_v14 = vmax.f32 %v662_v54, 0.0  ;;  %1019 = vmatpush1.msra.mxu0 %v2133_v26  ;;  %1311 = vmatprep.subr.mxu1 %v2136_v2  ;;  %v520_v32 = vadd.f32 %v519_v11, %v3311_v15  ;;  %v666_v10 = vadd.f32 %v665_v59, %v3311_v15  ;;  %v2121_v20 = vld [vmem:[%s4083_s3 + $0x250] sm:$0xff]  ;;  %v2120_v54 = vld [vmem:[%s4083_s3 + $0x248] sm:$0xff]  ;;  %v2114_v11 = vld [vmem:[%s4083_s3 + $0x218] sm:$0xff] }
 0x12e   :  { %1020 = vmatprep.subr.mxu0 %v2132_v27  ;;  %1191 = vmatprep.mubr.f32.mxu1 %v4141_v18  ;;  %v3470_v16 = vmax.f32 %v704_v63, %v705_v57  ;;  %v521_v33 = vpop.f32.mrf.mxu0  ;;  %v667_v34 = vpop.f32.mrf.mxu1  ;;  %v706_v38 = vmax.f32 %v536_v61, %v682_v12  ;;  %v247_v15 = vmax.f32 %v230_v29, 0.0  ;;  %v2124_v63 = vld [vmem:[%s4083_s3 + $0x268] sm:$0xff]  ;;  %v2118_v57 = vld [vmem:[%s4083_s3 + $0x238] sm:$0xff]  ;;  %v2117_v61 = vld [vmem:[%s4083_s3 + $0x230] sm:$0xff] }
 0x12f   :  { %1021 = vmatpush1.msra.mxu0 %v2131_v58  ;;  %1312 = vmatpush1.msra.mxu1 %v2135_v0  ;;  %v538_v36 = vmax.f32 %v520_v32, 0.0  ;;  %v522_v37 = vadd.f32 %v521_v33, %v3315_v13  ;;  %v668_v21 = vadd.f32 %v667_v34, %v3315_v13  ;;  %v707_v39 = vmax.f32 %v537_v9, %v683_v14  ;;  %v2128_v13 = vld [vmem:[%s4083_s3 + $0x288] sm:$0xff]  ;;  %v2113_v59 = vld [vmem:[%s4083_s3 + $0x210] sm:$0xff]  ;;  %v2111_v14 = vld [vmem:[%s4083_s3 + $0x200] sm:$0xff] }
 0x130   :  { %869 = vmatprep.mubr.f32.mxu0 %v4141_v18  ;;  %1022 = vmatprep.subr.mxu0 %v2130_v53  ;;  %v684_v17 = vmax.f32 %v666_v10, 0.0  ;;  %v392_v0 = vmax.f32 %v374_v30, 0.0  ;;  %v697_v7 = vmax.f32 %v247_v15, %v393_v28  ;;  %v2116_v12 = vld [vmem:[%s4083_s3 + $0x228] sm:$0xff]  ;;  %v2529_v32 = vld [vmem:[%s4083_s3 + $0xf8] sm:$0xff]  ;;  %v4154_v34 = vld [vmem:[#allocation20_spill] sm:$0xff] }
 0x131   :  { %1192 = vmatmul.mubr.f32.gmra.mxu1 %v3357_v62  ;;  %1313 = vmatprep.subr.mxu1 %v2134_v46  ;;  %v539_v5 = vmax.f32 %v522_v37, 0.0  ;;  %v685_v41 = vmax.f32 %v668_v21, 0.0  ;;  %v3499_v3 = vmax.f32 %v706_v38, %v707_v39  ;;  %v2125_v46 = vld [vmem:[%s4083_s3 + $0x270] sm:$0xff]  ;;  %v671_v29 = vpop.f32.mrf.mxu1  ;;  %v2112_v9 = vld [vmem:[%s4083_s3 + $0x208] sm:$0xff]  ;;  %v4159_v30 = vld [vmem:[#allocation25_spill] sm:$0xff] }
 0x132   :  { %870 = vmatmul.mubr.f32.gmra.mxu0 %v3470_v16  ;;  %1314 = vmatpush1.msra.mxu1 %v2133_v26  ;;  %v3491_v2 = vmax.f32 %v538_v36, %v684_v17  ;;  %v696_v49 = vmax.f32 %v246_v45, %v392_v0  ;;  %v4153_v10 = vld [vmem:[#allocation19_spill] sm:$0xff]  ;;  %v4156_v36 = vld [vmem:[#allocation22_spill] sm:$0xff]  ;;  %v4158_v21 = vld [vmem:[#allocation24_spill] sm:$0xff] }
 0x133   :  { %1023 = vmatpush1.msra.mxu0 %v2129_v40  ;;  %1315 = vmatprep.subr.mxu1 %v2132_v27  ;;  %v3496_v6 = vmax.f32 %v539_v5, %v685_v41  ;;  %v2119_v27 = vld [vmem:[%s4083_s3 + $0x240] sm:$0xff]  ;;  %v4157_v37 = vld [vmem:[#allocation23_spill] sm:$0xff]  ;;  %v4163_v17 = vld [vmem:[#allocation29_spill] sm:$0xff] }
 0x134   :  { %1024 = vmatprep.subr.mxu0 %v2128_v13  ;;  %1197 = vmatprep.mubr.f32.mxu1 %v4141_v18  ;;  %v3519_v26 = vmax.f32 %v696_v49, %v697_v7  ;;  %v4160_v38 = vld [vmem:[#allocation26_spill] sm:$0xff]  ;;  %v4161_v39 = vld [vmem:[#allocation27_spill] sm:$0xff]  ;;  %v2158_v5 = vld [vmem:[%s4085_s5 + $0xf0] sm:$0xff] }
 0x135   :  { %1025 = vmatpush1.msra.mxu0 %v2127_v23  ;;  %1316 = vmatpush1.msra.mxu1 %v2131_v58  ;;  %v721_v24 = vmax.f32 %v3491_v2, %v3496_v6  ;;  %v2115_v58 = vld [vmem:[%s4083_s3 + $0x220] sm:$0xff]  ;;  %v1488_v41 = vld [vmem:[%s4085_s5 + $0x58] sm:$0xff]  ;;  %v2157_v15 = vld [vmem:[%s4085_s5 + $0xe8] sm:$0xff] }
 0x136   :  { %875 = vmatprep.mubr.f32.mxu0 %v4141_v18  ;;  %1026 = vmatprep.subr.mxu0 %v2126_v42  ;;  %v1487_v28 = vld [vmem:[%s4085_s5 + $0x50] sm:$0xff]  ;;  %v1486_v2 = vld [vmem:[%s4085_s5 + $0x48] sm:$0xff]  ;;  %v1485_v6 = vld [vmem:[%s4085_s5 + $0x40] sm:$0xff] }
 0x137   :  { %1198 = vmatmul.mubr.f32.gmra.mxu1 %v3374_v31  ;;  %1317 = vmatprep.subr.mxu1 %v2130_v53  ;;  %v672_v53 = vpop.f32.mrf.mxu1  ;;  %v2154_v45 = vld [vmem:[%s4085_s5 + $0xd0] sm:$0xff]  ;;  %v1484_v0 = vld [vmem:[%s4085_s5 + $0x38] sm:$0xff]  ;;  %v2152_v7 = vld [vmem:[%s4085_s5 + $0xc0] sm:$0xff] }
 0x138   :  { %876 = vmatmul.mubr.f32.gmra.mxu0 %v3499_v3  ;;  %1318 = vmatpush1.msra.mxu1 %v2129_v40  ;;  %v4162_v40 = vld [vmem:[#allocation28_spill] sm:$0xff]  ;;  %v1481_v49 = vld [vmem:[%s4085_s5 + $0x20] sm:$0xff] }
 0x139   :  { %1027 = vmatpush1.msra.mxu0 %v2125_v46  ;;  %1319 = vmatprep.subr.mxu1 %v2128_v13  ;;  %v1489_v13 = vld [vmem:[%s4085_s5 + $0x60] sm:$0xff] }
 0x13a   :  { %1028 = vmatprep.subr.mxu0 %v2124_v63  ;;  %1203 = vmatprep.mubr.f32.mxu1 %v4141_v18 }
 0x13b   :  { %1029 = vmatpush1.msra.mxu0 %v2123_v22  ;;  %1320 = vmatpush1.msra.mxu1 %v2127_v23  ;;  %v2156_v23 = vld [vmem:[%s4085_s5 + $0xe0] sm:$0xff] }
 0x13c   :  { %1030 = vmatprep.subr.mxu0 %v2122_v1  ;;  %1204 = vmatmul.mubr.f32.gmra.mxu1 %v3519_v26 }
 0x13d   :  { %1321 = vmatprep.subr.mxu1 %v2126_v42  ;;  %1031 = vmatpush1.msra.mxu0 %v2121_v20  ;;  %v2155_v42 = vld [vmem:[%s4085_s5 + $0xd8] sm:$0xff] }
 0x13e   :  { %1322 = vmatpush1.msra.mxu1 %v2125_v46  ;;  %1032 = vmatprep.subr.mxu0 %v2120_v54  ;;  %v1482_v46 = vld [vmem:[%s4085_s5 + $0x28] sm:$0xff] }
 0x13f   :  { %1323 = vmatprep.subr.mxu1 %v2124_v63  ;;  %1033 = vmatpush1.msra.mxu0 %v2119_v27  ;;  %v2151_v63 = vld [vmem:[%s4085_s5 + $0xb8] sm:$0xff] }
 0x140   :  { %1324 = vmatpush1.msra.mxu1 %v2123_v22  ;;  %1034 = vmatprep.subr.mxu0 %v2118_v57  ;;  %v2150_v22 = vld [vmem:[%s4085_s5 + $0xb0] sm:$0xff] }
 0x141   :  { %1325 = vmatprep.subr.mxu1 %v2122_v1  ;;  %1035 = vmatpush1.msra.mxu0 %v2117_v61  ;;  %v1480_v1 = vld [vmem:[%s4085_s5 + $0x18] sm:$0xff] }
 0x142   :  { %1326 = vmatpush1.msra.mxu1 %v2121_v20  ;;  %1036 = vmatprep.subr.mxu0 %v2116_v12  ;;  %v1479_v20 = vld [vmem:[%s4085_s5 + $0x10] sm:$0xff] }
 0x143   :  { %1327 = vmatprep.subr.mxu1 %v2120_v54  ;;  %1037 = vmatpush1.msra.mxu0 %v2115_v58  ;;  %v2148_v54 = vld [vmem:[%s4085_s5 + $0xa0] sm:$0xff] }
 0x144   :  { %1328 = vmatpush1.msra.mxu1 %v2119_v27  ;;  %1038 = vmatprep.subr.mxu0 %v2114_v11  ;;  %v1478_v27 = vld [vmem:[%s4085_s5 + $0x8] sm:$0xff] }
 0x145   :  { %1329 = vmatprep.subr.mxu1 %v2118_v57  ;;  %1039 = vmatpush1.msra.mxu0 %v2113_v59  ;;  %v2147_v57 = vld [vmem:[%s4085_s5 + $0x98] sm:$0xff] }
 0x146   :  { %1330 = vmatpush1.msra.mxu1 %v2117_v61  ;;  %1040 = vmatprep.subr.mxu0 %v2112_v9  ;;  %v1477_v61 = vld [vmem:[%s4085_s5] sm:$0xff] }
 0x147   :  { %1331 = vmatprep.subr.mxu1 %v2116_v12  ;;  %1041 = vmatpush1.msra.mxu0 %v2111_v14  ;;  %v2146_v12 = vld [vmem:[%s4085_s5 + $0x90] sm:$0xff] }
 0x148   :  { %1074 = vmatprep.mubr.f32.mxu0 %v4141_v18  ;;  %1332 = vmatpush1.msra.mxu1 %v2115_v58  ;;  %v2145_v58 = vld [vmem:[%s4085_s5 + $0x88] sm:$0xff] }
 0x149   :  { %1075 = vmatmul.mubr.f32.vlgmr.msra.gmra.mxu0 %v3333_v60  ;;  %1210 = vmatprep.subr.mxu0 %v2529_v32  ;;  %v4150_v60 = vld [vmem:[#allocation16_spill] sm:$0xff] }
 0x14a   :  { %1333 = vmatprep.subr.mxu1 %v2114_v11  ;;  %1211 = vmatpush1.msra.mxu0 %v2530_v19  ;;  %v2144_v11 = vld [vmem:[%s4085_s5 + $0x80] sm:$0xff] }
 0x14b   :  { %1334 = vmatpush1.msra.mxu1 %v2113_v59  ;;  %1212 = vmatprep.subr.mxu0 %v2876_v43  ;;  %v4142_v43 = vld [vmem:[#allocation8_spill] sm:$0xff] }
 0x14c   :  { %1335 = vmatprep.subr.mxu1 %v2112_v9  ;;  %1080 = vmatprep.mubr.f32.mxu0 %v4141_v18 }
 0x14d   :  { %1213 = vmatpush1.msra.mxu0 %v2883_v44  ;;  %1336 = vmatpush1.msra.mxu1 %v2111_v14  ;;  %v4143_v44 = vld [vmem:[#allocation9_spill] sm:$0xff] }
 0x14e   :  { %1369 = vmatprep.mubr.f32.mxu1 %v4141_v18  ;;  %1081 = vmatmul.mubr.f32.gmra.mxu0 %v3345_v4  ;;  %v4151_v4 = vld [vmem:[#allocation17_spill] sm:$0xff] }
 0x14f   :  { %1214 = vmatprep.subr.mxu0 %v2898_v47  ;;  %1370 = vmatmul.mubr.f32.vlgmr.msra.gmra.mxu1 %v3425_v8  ;;  %v4144_v47 = vld [vmem:[#allocation10_spill] sm:$0xff] }
 0x150   :  { %1215 = vmatpush1.msra.mxu0 %v2905_v48  ;;  %1086 = vmatprep.mubr.f32.mxu0 %v4141_v18  ;;  %v4145_v48 = vld [vmem:[#allocation11_spill] sm:$0xff] }
 0x151   :  { %1216 = vmatprep.subr.mxu0 %v2920_v51  ;;  %1375 = vmatprep.mubr.f32.mxu1 %v4141_v18  ;;  %v4146_v51 = vld [vmem:[#allocation12_spill] sm:$0xff] }
 0x152   :  { %1217 = vmatpush1.msra.mxu0 %v2927_v52  ;;  %2346 = vmatprep.subr.mxu1 %v4141_v18  ;;  %v4147_v52 = vld [vmem:[#allocation13_spill] sm:$0xff] }
 0x153   :  { %1087 = vmatmul.mubr.f32.gmra.mxu0 %v3357_v62  ;;  %1218 = vmatprep.subr.mxu0 %v2942_v55  ;;  %v4148_v55 = vld [vmem:[#allocation14_spill] sm:$0xff]  ;;  %v525_v62 = vpop.f32.mrf.mxu0 }
 0x154   :  { %1376 = vmatmul.mubr.f32.gmra.mxu1 %v3447_v25  ;;  %1219 = vmatpush1.msra.mxu0 %v2949_v56  ;;  %v4149_v56 = vld [vmem:[#allocation15_spill] sm:$0xff] }
 0x155   :  { %1220 = vmatprep.subr.mxu0 %v4142_v43  ;;  %1092 = vmatprep.mubr.f32.mxu0 %v4141_v18  ;;  %v526_v33 = vpop.f32.mrf.mxu0 }
 0x156   :  { %1221 = vmatpush1.msra.mxu0 %v4143_v44  ;;  %1381 = vmatprep.mubr.f32.mxu1 %v4141_v18 }
 0x157   :  { %1093 = vmatmul.mubr.f32.gmra.mxu0 %v3374_v31  ;;  %1222 = vmatprep.subr.mxu0 %v4144_v47  ;;  %v4152_v31 = vld [vmem:[#allocation18_spill] sm:$0xff] }
 0x158   :  { %1382 = vmatmul.mubr.f32.gmra.mxu1 %v3470_v16  ;;  %1223 = vmatpush1.msra.mxu0 %v4145_v48 }
 0x159   :  { %1224 = vmatprep.subr.mxu0 %v4146_v51  ;;  %1098 = vmatprep.mubr.f32.mxu0 %v4141_v18 }
 0x15a   :  { %1225 = vmatpush1.msra.mxu0 %v4147_v52  ;;  %1387 = vmatprep.mubr.f32.mxu1 %v4141_v18 }
 0x15b   :  { %1099 = vmatmul.mubr.f32.gmra.mxu0 %v3519_v26  ;;  %1226 = vmatprep.subr.mxu0 %v4148_v55  ;;  %v2149_v26 = vld [vmem:[%s4085_s5 + $0xa8] sm:$0xff] }
 0x15c   :  { %1388 = vmatmul.mubr.f32.gmra.mxu1 %v3499_v3  ;;  %1227 = vmatpush1.msra.mxu0 %v4149_v56 }
 0x15d   :  { %1228 = vmatprep.subr.mxu0 %v4150_v60  ;;  %1274 = vmatprep.mubr.f32.mxu0 %v4141_v18 }
 0x15e   :  { %1229 = vmatpush1.msra.mxu0 %v4151_v4  ;;  %1393 = vmatprep.mubr.f32.mxu1 %v4141_v18 }
 0x15f   :  { %1230 = vmatprep.subr.mxu0 %v4152_v31 }
 0x160   :  { %1231 = vmatpush1.msra.mxu0 %v4153_v10  ;;  %1394 = vmatmul.mubr.f32.gmra.mxu1 %v721_v24  ;;  %v1483_v24 = vld [vmem:[%s4085_s5 + $0x30] sm:$0xff] }
 0x161   :  { %1232 = vmatprep.subr.mxu0 %v4154_v34  ;;  %2378 = vmatprep.mubr.msk.f32.mxu1 %vm2582_vm2, %v4141_v18 }
 0x162   :  { %1233 = vmatpush1.msra.mxu0 %v4155_v35 }
 0x163   :  { %1234 = vmatprep.subr.mxu0 %v4156_v36 }
 0x164   :  { %1235 = vmatpush1.msra.mxu0 %v4157_v37 }
 0x165   :  { %1236 = vmatprep.subr.mxu0 %v4158_v21 }
 0x166   :  { %1237 = vmatpush1.msra.mxu0 %v4159_v30 }
 0x167   :  { %1238 = vmatprep.subr.mxu0 %v4160_v38 }
 0x168   :  { %1239 = vmatpush1.msra.mxu0 %v4161_v39 }
 0x169   :  { %1240 = vmatprep.subr.mxu0 %v4162_v40 }
 0x16a   :  { %1241 = vmatpush1.msra.mxu0 %v4163_v17 }
 0x16b   :  { %1275 = vmatmul.mubr.f32.vlgmr.msra.gmra.mxu0 %v3400_v50  ;;  %2311 = vmatprep.subr.mxu0 %v4141_v18  ;;  %v1492_v50 = vld [vmem:[%s4085_s5 + $0x78] sm:$0xff] }
 0x16c   :  { %1280 = vmatprep.mubr.f32.mxu0 %v4141_v18  ;;  %2312 = vmatpush3.msra.mxu0 %v1492_v50 }
 0x16d   :  { %2313 = vmatprep.subr.mxu0 %v4141_v18 }
 0x16f   :  { %1281 = vmatmul.mubr.f32.gmra.mxu0 %v3425_v8  ;;  %v1491_v8 = vld [vmem:[%s4085_s5 + $0x70] sm:$0xff] }
 0x170   :  { %1286 = vmatprep.mubr.f32.mxu0 %v4141_v18  ;;  %2314 = vmatpush3.msra.mxu0 %v1491_v8 }
 0x171   :  { %2315 = vmatprep.subr.mxu0 %v4141_v18 }
 0x173   :  { %1287 = vmatmul.mubr.f32.gmra.mxu0 %v3447_v25  ;;  %v1490_v25 = vld [vmem:[%s4085_s5 + $0x68] sm:$0xff] }
 0x174   :  { %1292 = vmatprep.mubr.f32.mxu0 %v4141_v18  ;;  %2316 = vmatpush3.msra.mxu0 %v1490_v25 }
 0x175   :  { %2317 = vmatprep.subr.mxu0 %v4141_v18 }
 0x176   :  { %2318 = vmatpush3.msra.mxu0 %v1489_v13 }
 0x177   :  { %1293 = vmatmul.mubr.f32.gmra.mxu0 %v3470_v16  ;;  %v2159_v16 = vld [vmem:[%s4085_s5 + $0xf8] sm:$0xff]  ;;  %2319 = vmatprep.subr.mxu0 %v4141_v18 }
 0x178   :  { %1298 = vmatprep.mubr.f32.mxu0 %v4141_v18  ;;  %2347 = vmatpush3.msra.mxu1 %v2159_v16 }
 0x179   :  { %2348 = vmatprep.subr.mxu1 %v4141_v18  ;;  %2320 = vmatpush3.msra.mxu0 %v1488_v41 }
 0x17a   :  { %2349 = vmatpush3.msra.mxu1 %v2158_v5  ;;  %2321 = vmatprep.subr.mxu0 %v4141_v18 }
 0x17b   :  { %1299 = vmatmul.mubr.f32.gmra.mxu0 %v3499_v3  ;;  %2350 = vmatprep.subr.mxu1 %v4141_v18  ;;  %v2153_v3 = vld [vmem:[%s4085_s5 + $0xc8] sm:$0xff] }
 0x17c   :  { %2351 = vmatpush3.msra.mxu1 %v2157_v15  ;;  %2322 = vmatpush3.msra.mxu0 %v1487_v28 }
 0x17d   :  { %2352 = vmatprep.subr.mxu1 %v4141_v18  ;;  %2323 = vmatprep.subr.mxu0 %v4141_v18 }
 0x17e   :  { %2353 = vmatpush3.msra.mxu1 %v2156_v23  ;;  %2324 = vmatpush3.msra.mxu0 %v1486_v2  ;;  %v83_v2 = vld [vmem:[%s4084_s4] sm:$0x3] }
 0x17f   :  { %2354 = vmatprep.subr.mxu1 %v4141_v18  ;;  %2325 = vmatprep.subr.mxu0 %v4141_v18 }
 0x180   :  { %2355 = vmatpush3.msra.mxu1 %v2155_v42  ;;  %2326 = vmatpush3.msra.mxu0 %v1485_v6 }
 0x181   :  { %2356 = vmatprep.subr.mxu1 %v4141_v18  ;;  %2327 = vmatprep.subr.mxu0 %v4141_v18 }
 0x182   :  { %2357 = vmatpush3.msra.mxu1 %v2154_v45  ;;  %2328 = vmatpush3.msra.mxu0 %v1484_v0  ;;  %v4164_v0 = vld [vmem:[#allocation30_spill] sm:$0xff] }
 0x183   :  { %2358 = vmatprep.subr.mxu1 %v4141_v18  ;;  %2329 = vmatprep.subr.mxu0 %v4141_v18 }
 0x184   :  { %2359 = vmatpush3.msra.mxu1 %v2153_v3  ;;  %2330 = vmatpush3.msra.mxu0 %v1483_v24  ;;  %v4165_v3 = vsub.s32 0, %v4164_v0 }
 0x185   :  { %2360 = vmatprep.subr.mxu1 %v4141_v18  ;;  %2331 = vmatprep.subr.mxu0 %v4141_v18 }
 0x186   :  { %2361 = vmatpush3.msra.mxu1 %v2152_v7  ;;  %2332 = vmatpush3.msra.mxu0 %v1482_v46  ;;  %v3786_v24 = vrot.slane %v83_v2, %v4165_v3 }
 0x187   :  { %2362 = vmatprep.subr.mxu1 %v4141_v18  ;;  %2333 = vmatprep.subr.mxu0 %v4141_v18 }
 0x188   :  { %2363 = vmatpush3.msra.mxu1 %v2151_v63  ;;  %2334 = vmatpush3.msra.mxu0 %v1481_v49  ;;  %v4166_v63 = vsub.s32 1, %v4164_v0 }
 0x189   :  { %2364 = vmatprep.subr.mxu1 %v4141_v18  ;;  %2335 = vmatprep.subr.mxu0 %v4141_v18 }
 0x18a   :  { %2365 = vmatpush3.msra.mxu1 %v2150_v22  ;;  %2336 = vmatpush3.msra.mxu0 %v1480_v1  ;;  %v3790_v49 = vrot.slane %v83_v2, %v4166_v63 }
 0x18b   :  { %2366 = vmatprep.subr.mxu1 %v4141_v18  ;;  %2337 = vmatprep.subr.mxu0 %v4141_v18 }
 0x18c   :  { %2367 = vmatpush3.msra.mxu1 %v2149_v26  ;;  %2338 = vmatpush3.msra.mxu0 %v1479_v20 }
 0x18d   :  { %2368 = vmatprep.subr.mxu1 %v4141_v18  ;;  %2339 = vmatprep.subr.mxu0 %v4141_v18 }
 0x18e   :  { %2369 = vmatpush3.msra.mxu1 %v2148_v54  ;;  %2340 = vmatpush3.msra.mxu0 %v1478_v27 }
 0x18f   :  { %2370 = vmatprep.subr.mxu1 %v4141_v18  ;;  %2341 = vmatprep.subr.mxu0 %v4141_v18 }
 0x190   :  { %2371 = vmatpush3.msra.mxu1 %v2147_v57  ;;  %2342 = vmatpush3.msra.mxu0 %v1477_v61 }
 0x191   :  { %2372 = vmatprep.subr.mxu1 %v4141_v18  ;;  %2343 = vmatprep.mubr.msk.f32.mxu0 %vm2582_vm2, %v4141_v18 }
 0x192   :  { %2373 = vmatpush3.msra.mxu1 %v2146_v12  ;;  %2381 = vmatprep.subr.mxu0 %v4141_v18 }
 0x193   :  { %2374 = vmatprep.subr.mxu1 %v4141_v18 }
 0x194   :  { %2375 = vmatpush3.msra.mxu1 %v2145_v58 }
 0x195   :  { %2376 = vmatprep.subr.mxu1 %v4141_v18 }
 0x196   :  { %2377 = vmatpush3.msra.mxu1 %v2144_v11 }
 0x197   :  { %2416 = vmatprep.subr.mxu1 %v4141_v18 }
 0x1bf   :  { %v948_v59 = vpop.f32.mrf.mxu1 }
 0x1c1   :  { %v950_v29 = vpop.f32.mrf.mxu1 }
 0x1c4   :  { %v954_v9 = vpop.f32.mrf.mxu1 }
 0x1c6   :  { %v956_v14 = vpop.f32.mrf.mxu1 }
 0x1c9   :  { %v960_v53 = vpop.f32.mrf.mxu1 }
 0x1cb   :  { %v962_v32 = vpop.f32.mrf.mxu1 }
 0x1ce   :  { %v966_v44 = vpop.f32.mrf.mxu1 }
 0x1d0   :  { %v3757_v51 = vpop.f32.mrf.mxu1 }
 0x1d4   :  { %v972_v60 = vpop.f32.mrf.mxu1 }
 0x1d6   :  { %v974_v62 = vpop.f32.mrf.mxu1 }
 0x1e2   :  { %v1181_v33 = vpop.f32.mrf.mxu1 }
 0x1e3   :  { %v853_v19 = vpop.f32.mrf.mxu0 }
 0x1e4   :  { %v1183_v35 = vpop.f32.mrf.mxu1  ;;  %v949_v57 = vadd.f32 %v948_v59, %v853_v19 }
 0x1e5   :  { %v855_v43 = vpop.f32.mrf.mxu0 }
 0x1e6   :  { %v951_v61 = vadd.f32 %v950_v29, %v855_v43 }
 0x1e8   :  { %v859_v47 = vpop.f32.mrf.mxu0  ;;  %v1187_v30 = vpop.f32.mrf.mxu1 }
 0x1ea   :  { %v861_v48 = vpop.f32.mrf.mxu0  ;;  %v1189_v38 = vpop.f32.mrf.mxu1 }
 0x1ec   :  { %v865_v52 = vpop.f32.mrf.mxu0 }
 0x1ed   :  { %v3759_v55 = vadd.f32 %v960_v53, %v865_v52  ;;  %v955_v52 = vadd.f32 %v954_v9, %v859_v47 }
 0x1ee   :  { %v867_v56 = vpop.f32.mrf.mxu0 }
 0x1f1   :  { %v3765_v39 = vpop.f32.mrf.mxu1 }
 0x1f2   :  { %v871_v4 = vpop.f32.mrf.mxu0 }
 0x1f3   :  { %v3761_v31 = vadd.f32 %v966_v44, %v871_v4  ;;  %v3767_v40 = vpop.f32.mrf.mxu1  ;;  %v957_v4 = vadd.f32 %v956_v14, %v861_v48 }
 0x1f4   :  { %v3763_v10 = vpop.f32.mrf.mxu0 }
 0x1f7   :  { %v3769_v8 = vpop.f32.mrf.mxu1 }
 0x1f8   :  { %v877_v34 = vpop.f32.mrf.mxu0 }
 0x1f9   :  { %v973_v36 = vadd.f32 %v972_v60, %v877_v34  ;;  %v3771_v13 = vpop.f32.mrf.mxu1 }
 0x1fa   :  { %v879_v37 = vpop.f32.mrf.mxu0 }
 0x1fb   :  { %v975_v21 = vadd.f32 %v974_v62, %v879_v37 }
 0x1fc   :  { %v3773_v41 = vpop.f32.mrf.mxu1 }
 0x1fe   :  { %v3777_v23 = vpop.f32.mrf.mxu1 }
 0x209   :  { %v1076_v17 = vpop.f32.mrf.mxu0 }
 0x20a   :  { %v1105_v12 = vadd.f32 %v1076_v17, %v949_v57 }
 0x20b   :  { %v1078_v50 = vpop.f32.mrf.mxu0 }
 0x20c   :  { %v1106_v58 = vadd.f32 %v1078_v50, %v951_v61  ;;  %v1421_v37 = vadd.f32 %v3786_v24, %v1105_v12 }
 0x20e   :  { %v1082_v25 = vpop.f32.mrf.mxu0  ;;  %v1431_v17 = vmax.f32 %v1421_v37, 0.0 }
 0x20f   :  { %v1371_v6 = vpop.f32.mrf.mxu1  ;;  %v1107_v2 = vadd.f32 %v1082_v25, %v955_v52 }
 0x210   :  { %v1084_v16 = vpop.f32.mrf.mxu0 }
 0x211   :  { %v1373_v26 = vpop.f32.mrf.mxu1  ;;  %v1108_v59 = vadd.f32 %v1084_v16, %v957_v4  ;;  %v1423_v25 = vadd.f32 %v3786_v24, %v1107_v2 }
 0x213   :  { %v1088_v5 = vpop.f32.mrf.mxu0 }
 0x214   :  { %v1377_v54 = vpop.f32.mrf.mxu1 }
 0x215   :  { %v1090_v15 = vpop.f32.mrf.mxu0 }
 0x216   :  { %v1379_v27 = vpop.f32.mrf.mxu1 }
 0x217   :  { %v3775_v28 = vpop.f32.mrf.mxu0 }
 0x218   :  { %v1383_v11 = vpop.f32.mrf.mxu1  ;;  %v1111_v57 = vadd.f32 %v3775_v28, %v3761_v31 }
 0x219   :  { %v3782_v42 = vpop.f32.mrf.mxu0 }
 0x21a   :  { %v1427_v2 = vadd.f32 %v3786_v24, %v1111_v57 }
 0x21b   :  { %v1100_v45 = vpop.f32.mrf.mxu0 }
 0x21c   :  { %v1113_v7 = vadd.f32 %v1100_v45, %v973_v36  ;;  %v963_v36 = vadd.f32 %v962_v32, %v867_v56  ;;  %v1385_v45 = vpop.f32.mrf.mxu1 }
 0x21d   :  { %v1102_v46 = vpop.f32.mrf.mxu0 }
 0x21e   :  { %v3793_v22 = vadd.f32 %v3786_v24, %v1113_v7  ;;  %v1114_v1 = vadd.f32 %v1102_v46, %v975_v21  ;;  %v1422_v21 = vadd.f32 %v3790_v49, %v1106_v58  ;;  %v1110_v9 = vadd.f32 %v1090_v15, %v963_v36  ;;  %v1389_v16 = vpop.f32.mrf.mxu1 }
 0x220   :  { %v3796_v20 = vadd.f32 %v3790_v49, %v1114_v1  ;;  %v1432_v50 = vmax.f32 %v1422_v21, 0.0  ;;  %v1426_v7 = vadd.f32 %v3790_v49, %v1110_v9  ;;  %v1391_v61 = vpop.f32.mrf.mxu1  ;;  %v2174_v21 = vld [vmem:[%s4085_s5 + $0x170] sm:$0xff] }
 0x222   :  { %v1395_v28 = vpop.f32.mrf.mxu1 }
 0x22b   :  { %v1276_v53 = vpop.f32.mrf.mxu0 }
 0x22c   :  { %v1277_v44 = vadd.f32 %v1276_v53, %v1181_v33  ;;  %v1109_v33 = vadd.f32 %v1088_v5, %v3759_v55 }
 0x22d   :  { %v1278_v60 = vpop.f32.mrf.mxu0 }
 0x22e   :  { %v1400_v62 = vadd.f32 %v1371_v6, %v1277_v44  ;;  %v1279_v34 = vadd.f32 %v1278_v60, %v1183_v35  ;;  %v969_v35 = vadd.f32 %v3757_v51, %v3763_v10  ;;  %v1425_v15 = vadd.f32 %v3786_v24, %v1109_v33  ;;  %v2175_v60 = vld [vmem:[%s4085_s5 + $0x178] sm:$0xff]  ;;  %v2173_v33 = vld [vmem:[%s4085_s5 + $0x168] sm:$0xff] }
 0x22f   :  { %v1282_v0 = vpop.f32.mrf.mxu0 }
 0x230   :  { %v1441_v29 = vadd.f32 %v3786_v24, %v1400_v62  ;;  %v1401_v19 = vadd.f32 %v1373_v26, %v1279_v34  ;;  %v1283_v43 = vadd.f32 %v1282_v0, %v1187_v30  ;;  %v1424_v30 = vadd.f32 %v3790_v49, %v1108_v59 }
 0x231   :  { %v1284_v47 = vpop.f32.mrf.mxu0  ;;  %v1435_v4 = vmax.f32 %v1425_v15, 0.0  ;;  %v1436_v62 = vmax.f32 %v1426_v7, 0.0  ;;  %v1439_v7 = vmax.f32 %v3793_v22, 0.0  ;;  %v2170_v22 = vld [vmem:[%s4085_s5 + $0x150] sm:$0xff] }
 0x232   :  { %v1451_v14 = vmax.f32 %v1441_v29, 0.0  ;;  %v1442_v48 = vadd.f32 %v3790_v49, %v1401_v19  ;;  %v1402_v32 = vadd.f32 %v1377_v54, %v1283_v43  ;;  %v1285_v56 = vadd.f32 %v1284_v47, %v1189_v38 }
 0x233   :  { %v1288_v6 = vpop.f32.mrf.mxu0  ;;  %v1433_v54 = vmax.f32 %v1423_v25, 0.0  ;;  %v1434_v53 = vmax.f32 %v1424_v30, 0.0  ;;  %v1437_v25 = vmax.f32 %v1427_v2, 0.0  ;;  %v2190_v30 = vld [vmem:[%s4085_s5 + $0x1f0] sm:$0xff]  ;;  %v2177_v2 = vld [vmem:[%s4085_s5 + $0x188] sm:$0xff] }
 0x234   :  { %v1452_v3 = vmax.f32 %v1442_v48, 0.0  ;;  %v1443_v55 = vadd.f32 %v3786_v24, %v1402_v32  ;;  %v1403_v5 = vadd.f32 %v1379_v27, %v1285_v56  ;;  %v1461_v38 = vmax.f32 %v1431_v17, %v1451_v14  ;;  %v2191_v48 = vld [vmem:[%s4085_s5 + $0x1f8] sm:$0xff]  ;;  %v1397_v32 = vpop.f32.mrf.mxu1 }
 0x235   :  { %v1289_v46 = vadd.f32 %v1288_v6, %v3765_v39  ;;  %v1290_v51 = vpop.f32.mrf.mxu0  ;;  %v1112_v27 = vadd.f32 %v3782_v42, %v969_v35 }
 0x236   :  { %v1462_v10 = vmax.f32 %v1432_v50, %v1452_v3  ;;  %v1453_v63 = vmax.f32 %v1443_v55, 0.0  ;;  %v1444_v1 = vadd.f32 %v3790_v49, %v1403_v5  ;;  %v1291_v26 = vadd.f32 %v1290_v51, %v3767_v40  ;;  %v2172_v50 = vld [vmem:[%s4085_s5 + $0x160] sm:$0xff]  ;;  %v2171_v5 = vld [vmem:[%s4085_s5 + $0x158] sm:$0xff] }
 0x237   :  { %v1404_v12 = vadd.f32 %v1383_v11, %v1289_v46  ;;  %v1294_v58 = vpop.f32.mrf.mxu0 }
 0x238   :  { %v1471_v44 = vmax.f32 %v1461_v38, %v1462_v10  ;;  %v1454_v52 = vmax.f32 %v1444_v1, 0.0  ;;  %v1405_v39 = vadd.f32 %v1385_v45, %v1291_v26  ;;  %v1295_v34 = vadd.f32 %v1294_v58, %v3769_v8 }
 0x239   :  { %v1445_v40 = vadd.f32 %v3786_v24, %v1404_v12  ;;  %v1296_v31 = vpop.f32.mrf.mxu0  ;;  %v1463_v42 = vmax.f32 %v1433_v54, %v1453_v63  ;;  %v1428_v45 = vadd.f32 %v3790_v49, %v1112_v27  ;;  %v2188_v63 = vld [vmem:[%s4085_s5 + $0x1e0] sm:$0xff]  ;;  %v1440_v1 = vmax.f32 %v3796_v20, 0.0  ;;  %v2187_v20 = vld [vmem:[%s4085_s5 + $0x1d8] sm:$0xff]  ;;  %v2186_v12 = vld [vmem:[%s4085_s5 + $0x1d0] sm:$0xff] }
 0x23a   :  { %v1464_v36 = vmax.f32 %v1434_v53, %v1454_v52  ;;  %v1446_v11 = vadd.f32 %v3790_v49, %v1405_v39  ;;  %v1297_v37 = vadd.f32 %v1296_v31, %v3771_v13  ;;  %2344 = vmatmul.mubr.f32.vlgmr.msra.gmra.mxu0 %v1471_v44  ;;  %v1406_v59 = vadd.f32 %v1389_v16, %v1295_v34  ;;  %v2167_v53 = vld [vmem:[%s4085_s5 + $0x138] sm:$0xff]  ;;  %v2185_v44 = vld [vmem:[%s4085_s5 + $0x1c8] sm:$0xff]  ;;  %v2166_v52 = vld [vmem:[%s4085_s5 + $0x130] sm:$0xff] }
 0x23b   :  { %v1455_v0 = vmax.f32 %v1445_v40, 0.0  ;;  %2382 = vmatpush3.msra.mxu0 %v2175_v60  ;;  %v1300_v8 = vpop.f32.mrf.mxu0  ;;  %2413 = vmatprep.mubr.msk.f32.mxu0 %vm2582_vm2, %v4141_v18  ;;  %v1438_v16 = vmax.f32 %v1428_v45, 0.0  ;;  %v2184_v39 = vld [vmem:[%s4085_s5 + $0x1c0] sm:$0xff]  ;;  %v2165_v60 = vld [vmem:[%s4085_s5 + $0x128] sm:$0xff]  ;;  %v2182_v40 = vld [vmem:[%s4085_s5 + $0x1b0] sm:$0xff] }
 0x23c   :  { %v1472_v29 = vmax.f32 %v1463_v42, %v1464_v36  ;;  %v1456_v19 = vmax.f32 %v1446_v11, 0.0  ;;  %v1407_v43 = vadd.f32 %v1391_v61, %v1297_v37  ;;  %v1301_v13 = vadd.f32 %v1300_v8, %v3773_v41  ;;  %2383 = vmatprep.subr.mxu0 %v4141_v18  ;;  %v2168_v61 = vld [vmem:[%s4085_s5 + $0x140] sm:$0xff]  ;;  %v2163_v34 = vld [vmem:[%s4085_s5 + $0x118] sm:$0xff]  ;;  %v2181_v31 = vld [vmem:[%s4085_s5 + $0x1a8] sm:$0xff] }
 0x23d   :  { %v3835_v9 = vmax.f32 %v1435_v4, %v1455_v0  ;;  %v1447_v47 = vadd.f32 %v3786_v24, %v1406_v59  ;;  %2384 = vmatpush3.msra.mxu0 %v2174_v21  ;;  %v1302_v14 = vpop.f32.mrf.mxu0  ;;  %v2183_v4 = vld [vmem:[%s4085_s5 + $0x1b8] sm:$0xff]  ;;  %v2180_v42 = vld [vmem:[%s4085_s5 + $0x1a0] sm:$0xff]  ;;  %v2161_v36 = vld [vmem:[%s4085_s5 + $0x108] sm:$0xff] }
 0x23e   :  { %v3841_v56 = vmax.f32 %v1436_v62, %v1456_v19  ;;  %v1448_v41 = vadd.f32 %v3790_v49, %v1407_v43  ;;  %v1303_v35 = vadd.f32 %v1302_v14, %v3777_v23  ;;  %v1408_v17 = vadd.f32 %v1395_v28, %v1301_v13  ;;  %2385 = vmatprep.subr.mxu0 %v4141_v18  ;;  %v2164_v62 = vld [vmem:[%s4085_s5 + $0x120] sm:$0xff]  ;;  %v2162_v28 = vld [vmem:[%s4085_s5 + $0x110] sm:$0xff]  ;;  %v2179_v11 = vld [vmem:[%s4085_s5 + $0x198] sm:$0xff] }
 0x23f   :  { %v1457_v6 = vmax.f32 %v1447_v47, 0.0  ;;  %2379 = vmatmul.mubr.f32.vlgmr.msra.gmra.mxu1 %v1472_v29  ;;  %2386 = vmatpush3.msra.mxu0 %v2173_v33  ;;  %v2160_v37 = vld [vmem:[%s4085_s5 + $0x100] sm:$0xff]  ;;  %v2178_v21 = vld [vmem:[%s4085_s5 + $0x190] sm:$0xff]  ;;  %v2207_v45 = vld [vmem:[%s4085_s5 + $0x278] sm:$0xff] }
 0x240   :  { %v1458_v3 = vmax.f32 %v1448_v41, 0.0  ;;  %v1449_v55 = vadd.f32 %v3786_v24, %v1408_v17  ;;  %2417 = vmatpush3.msra.mxu1 %v2191_v48  ;;  %v1409_v23 = vadd.f32 %v1397_v32, %v1303_v35  ;;  %2387 = vmatprep.subr.mxu0 %v4141_v18  ;;  %v1473_v15 = vmax.f32 %v3835_v9, %v3841_v56  ;;  %v2189_v24 = vld [vmem:[%s4085_s5 + $0x1e8] sm:$0xff]  ;;  %v2176_v0 = vld [vmem:[%s4085_s5 + $0x180] sm:$0xff]  ;;  %v2206_v59 = vld [vmem:[%s4085_s5 + $0x270] sm:$0xff] }
 0x241   :  { %2418 = vmatprep.subr.mxu1 %v4141_v18  ;;  %2388 = vmatpush3.msra.mxu0 %v2172_v50  ;;  %v3864_v38 = vmax.f32 %v1437_v25, %v1457_v6  ;;  %v2205_v8 = vld [vmem:[%s4085_s5 + $0x268] sm:$0xff]  ;;  %v2204_v29 = vld [vmem:[%s4085_s5 + $0x260] sm:$0xff]  ;;  %v2203_v19 = vld [vmem:[%s4085_s5 + $0x258] sm:$0xff] }
 0x242   :  { %v3866_v46 = vmax.f32 %v1438_v16, %v1458_v3  ;;  %v1459_v51 = vmax.f32 %v1449_v55, 0.0  ;;  %v1450_v10 = vadd.f32 %v3790_v49, %v1409_v23  ;;  %2419 = vmatpush3.msra.mxu1 %v2190_v30  ;;  %2389 = vmatprep.subr.mxu0 %v4141_v18  ;;  %v2169_v49 = vld [vmem:[%s4085_s5 + $0x148] sm:$0xff]  ;;  %v2202_v43 = vld [vmem:[%s4085_s5 + $0x250] sm:$0xff]  ;;  %v2200_v33 = vld [vmem:[%s4085_s5 + $0x240] sm:$0xff] }
 0x243   :  { %2420 = vmatprep.subr.mxu1 %v4141_v18  ;;  %2390 = vmatpush3.msra.mxu0 %v2171_v5  ;;  %v2201_v13 = vld [vmem:[%s4085_s5 + $0x248] sm:$0xff]  ;;  %v2199_v9 = vld [vmem:[%s4085_s5 + $0x238] sm:$0xff]  ;;  %v2198_v47 = vld [vmem:[%s4085_s5 + $0x230] sm:$0xff] }
 0x244   :  { %v3878_v26 = vmax.f32 %v1439_v7, %v1459_v51  ;;  %v1460_v54 = vmax.f32 %v1450_v10, 0.0  ;;  %2421 = vmatpush3.msra.mxu1 %v2189_v24  ;;  %2391 = vmatprep.subr.mxu0 %v4141_v18  ;;  %v1474_v57 = vmax.f32 %v3864_v38, %v3866_v46  ;;  %v2197_v14 = vld [vmem:[%s4085_s5 + $0x228] sm:$0xff]  ;;  %v2196_v48 = vld [vmem:[%s4085_s5 + $0x220] sm:$0xff]  ;;  %v2195_v32 = vld [vmem:[%s4085_s5 + $0x218] sm:$0xff] }
 0x245   :  { %2422 = vmatprep.subr.mxu1 %v4141_v18  ;;  %2392 = vmatpush3.msra.mxu0 %v2170_v22  ;;  %v2194_v56 = vld [vmem:[%s4085_s5 + $0x210] sm:$0xff]  ;;  %v2193_v41 = vld [vmem:[%s4085_s5 + $0x208] sm:$0xff]  ;;  %v2192_v35 = vld [vmem:[%s4085_s5 + $0x200] sm:$0xff] }
 0x246   :  { %v3890_v27 = vmax.f32 %v1440_v1, %v1460_v54  ;;  %2423 = vmatpush3.msra.mxu1 %v2188_v63  ;;  %2393 = vmatprep.subr.mxu0 %v4141_v18  ;;  %v1937_v17 = vld [vmem:[#allocation4 + $0x78] sm:$0xff]  ;;  %v1936_v50 = vld [vmem:[#allocation4 + $0x70] sm:$0xff]  ;;  %v1935_v25 = vld [vmem:[#allocation4 + $0x68] sm:$0xff] }
 0x247   :  { %2424 = vmatprep.subr.mxu1 %v4141_v18  ;;  %2394 = vmatpush3.msra.mxu0 %v2169_v49  ;;  %v1934_v16 = vld [vmem:[#allocation4 + $0x60] sm:$0xff]  ;;  %v1933_v6 = vld [vmem:[#allocation4 + $0x58] sm:$0xff]  ;;  %v1932_v30 = vld [vmem:[#allocation4 + $0x50] sm:$0xff] }
 0x248   :  { %v1475_v58 = vmax.f32 %v3878_v26, %v3890_v27  ;;  %2425 = vmatpush3.msra.mxu1 %v2187_v20  ;;  %2395 = vmatprep.subr.mxu0 %v4141_v18  ;;  %v1931_v3 = vld [vmem:[#allocation4 + $0x48] sm:$0xff]  ;;  %v1930_v55 = vld [vmem:[#allocation4 + $0x40] sm:$0xff]  ;;  %v1929_v23 = vld [vmem:[#allocation4 + $0x38] sm:$0xff] }
 0x249   :  { %2426 = vmatprep.subr.mxu1 %v4141_v18  ;;  %2396 = vmatpush3.msra.mxu0 %v2168_v61  ;;  %v1928_v5 = vld [vmem:[#allocation4 + $0x30] sm:$0xff]  ;;  %v1926_v7 = vld [vmem:[#allocation4 + $0x20] sm:$0xff]  ;;  %v1925_v24 = vld [vmem:[#allocation4 + $0x18] sm:$0xff] }
 0x24a   :  { %2427 = vmatpush3.msra.mxu1 %v2186_v12  ;;  %2397 = vmatprep.subr.mxu0 %v4141_v18  ;;  %v1924_v38 = vld [vmem:[#allocation4 + $0x10] sm:$0xff]  ;;  %v1923_v46 = vld [vmem:[#allocation4 + $0x8] sm:$0xff]  ;;  %v1922_v51 = vld [vmem:[#allocation4] sm:$0xff] }
 0x24b   :  { %2428 = vmatprep.subr.mxu1 %v4141_v18  ;;  %2398 = vmatpush3.msra.mxu0 %v2167_v53  ;;  %v2143_v20 = vld [vmem:[%s4086_s6] ss:$0 sm:$0xff] }
 0x24c   :  { %2429 = vmatpush3.msra.mxu1 %v2185_v44  ;;  %2399 = vmatprep.subr.mxu0 %v4141_v18 }
 0x24d   :  { %2430 = vmatprep.subr.mxu1 %v4141_v18  ;;  %2400 = vmatpush3.msra.mxu0 %v2166_v52  ;;  %v2208_v52 = vld [vmem:[%s4088_s8] ss:$0 sm:$0xff] }
 0x24e   :  { %2431 = vmatpush3.msra.mxu1 %v2184_v39  ;;  %2401 = vmatprep.subr.mxu0 %v4141_v18 }
 0x24f   :  { %2432 = vmatprep.subr.mxu1 %v4141_v18  ;;  %2402 = vmatpush3.msra.mxu0 %v2165_v60 }
 0x250   :  { %2433 = vmatpush3.msra.mxu1 %v2183_v4  ;;  %2403 = vmatprep.subr.mxu0 %v4141_v18 }
 0x251   :  { %2434 = vmatprep.subr.mxu1 %v4141_v18  ;;  %2404 = vmatpush3.msra.mxu0 %v2164_v62 }
 0x252   :  { %2435 = vmatpush3.msra.mxu1 %v2182_v40  ;;  %2405 = vmatprep.subr.mxu0 %v4141_v18 }
 0x253   :  { %2436 = vmatprep.subr.mxu1 %v4141_v18  ;;  %2406 = vmatpush3.msra.mxu0 %v2163_v34 }
 0x254   :  { %2437 = vmatpush3.msra.mxu1 %v2181_v31  ;;  %2407 = vmatprep.subr.mxu0 %v4141_v18 }
 0x255   :  { %2438 = vmatprep.subr.mxu1 %v4141_v18  ;;  %2408 = vmatpush3.msra.mxu0 %v2162_v28 }
 0x256   :  { %2439 = vmatpush3.msra.mxu1 %v2180_v42  ;;  %2409 = vmatprep.subr.mxu0 %v4141_v18 }
 0x257   :  { %2440 = vmatprep.subr.mxu1 %v4141_v18  ;;  %2410 = vmatpush3.msra.mxu0 %v2161_v36 }
 0x258   :  { %2441 = vmatpush3.msra.mxu1 %v2179_v11  ;;  %2411 = vmatprep.subr.mxu0 %v4141_v18 }
 0x259   :  { %2442 = vmatprep.subr.mxu1 %v4141_v18  ;;  %2412 = vmatpush3.msra.mxu0 %v2160_v37 }
 0x25a   :  { %2443 = vmatpush3.msra.mxu1 %v2178_v21  ;;  %2414 = vmatmul.mubr.f32.vlgmr.msra.gmra.mxu0 %v1473_v15  ;;  %v1927_v15 = vld [vmem:[#allocation4 + $0x28] sm:$0xff] }
 0x25b   :  { %2444 = vmatprep.subr.mxu1 %v4141_v18  ;;  %2451 = vmatprep.subr.mxu0 %v4141_v18 }
 0x25c   :  { %2445 = vmatpush3.msra.mxu1 %v2177_v2  ;;  %2452 = vmatpush3.msra.mxu0 %v2207_v45 }
 0x25d   :  { %2446 = vmatprep.subr.mxu1 %v4141_v18  ;;  %2453 = vmatprep.subr.mxu0 %v4141_v18 }
 0x25e   :  { %2447 = vmatpush3.msra.mxu1 %v2176_v0  ;;  %2448 = vmatprep.mubr.msk.f32.mxu1 %vm2582_vm2, %v4141_v18 }
 0x25f   :  { %2454 = vmatpush3.msra.mxu0 %v2206_v59  ;;  %2449 = vmatmul.mubr.f32.vlgmr.msra.gmra.mxu1 %v1474_v57 }
 0x260   :  { %2455 = vmatprep.subr.mxu0 %v4141_v18  ;;  %2483 = vmatprep.mubr.msk.f32.mxu0 %vm2582_vm2, %v4141_v18 }
 0x261   :  { %2456 = vmatpush3.msra.mxu0 %v2205_v8  ;;  %2486 = vmatprep.subr.mxu1 %v4141_v18 }
 0x262   :  { %2457 = vmatprep.subr.mxu0 %v4141_v18  ;;  %2518 = vmatprep.mubr.msk.f32.mxu1 %vm2582_vm2, %v4141_v18 }
 0x263   :  { %2458 = vmatpush3.msra.mxu0 %v2204_v29  ;;  %2487 = vmatpush3.msra.mxu1 %v1937_v17 }
 0x264   :  { %2459 = vmatprep.subr.mxu0 %v4141_v18  ;;  %2488 = vmatprep.subr.mxu1 %v4141_v18 }
 0x265   :  { %2460 = vmatpush3.msra.mxu0 %v2203_v19  ;;  %2489 = vmatpush3.msra.mxu1 %v1936_v50 }
 0x266   :  { %2461 = vmatprep.subr.mxu0 %v4141_v18  ;;  %2490 = vmatprep.subr.mxu1 %v4141_v18 }
 0x267   :  { %2462 = vmatpush3.msra.mxu0 %v2202_v43  ;;  %2491 = vmatpush3.msra.mxu1 %v1935_v25 }
 0x268   :  { %2463 = vmatprep.subr.mxu0 %v4141_v18  ;;  %2492 = vmatprep.subr.mxu1 %v4141_v18 }
 0x269   :  { %2464 = vmatpush3.msra.mxu0 %v2201_v13  ;;  %2493 = vmatpush3.msra.mxu1 %v1934_v16 }
 0x26a   :  { %2465 = vmatprep.subr.mxu0 %v4141_v18  ;;  %2494 = vmatprep.subr.mxu1 %v4141_v18 }
 0x26b   :  { %2466 = vmatpush3.msra.mxu0 %v2200_v33  ;;  %2495 = vmatpush3.msra.mxu1 %v1933_v6 }
 0x26c   :  { %2467 = vmatprep.subr.mxu0 %v4141_v18  ;;  %2496 = vmatprep.subr.mxu1 %v4141_v18 }
 0x26d   :  { %2468 = vmatpush3.msra.mxu0 %v2199_v9  ;;  %2497 = vmatpush3.msra.mxu1 %v1932_v30 }
 0x26e   :  { %2469 = vmatprep.subr.mxu0 %v4141_v18  ;;  %2498 = vmatprep.subr.mxu1 %v4141_v18 }
 0x26f   :  { %2470 = vmatpush3.msra.mxu0 %v2198_v47  ;;  %2499 = vmatpush3.msra.mxu1 %v1931_v3 }
 0x270   :  { %2471 = vmatprep.subr.mxu0 %v4141_v18  ;;  %2500 = vmatprep.subr.mxu1 %v4141_v18 }
 0x271   :  { %2472 = vmatpush3.msra.mxu0 %v2197_v14  ;;  %2501 = vmatpush3.msra.mxu1 %v1930_v55 }
 0x272   :  { %2473 = vmatprep.subr.mxu0 %v4141_v18  ;;  %2502 = vmatprep.subr.mxu1 %v4141_v18 }
 0x273   :  { %2474 = vmatpush3.msra.mxu0 %v2196_v48  ;;  %2503 = vmatpush3.msra.mxu1 %v1929_v23 }
 0x274   :  { %2475 = vmatprep.subr.mxu0 %v4141_v18  ;;  %2504 = vmatprep.subr.mxu1 %v4141_v18 }
 0x275   :  { %2476 = vmatpush3.msra.mxu0 %v2195_v32  ;;  %2505 = vmatpush3.msra.mxu1 %v1928_v5 }
 0x276   :  { %2477 = vmatprep.subr.mxu0 %v4141_v18  ;;  %2506 = vmatprep.subr.mxu1 %v4141_v18 }
 0x277   :  { %2478 = vmatpush3.msra.mxu0 %v2194_v56  ;;  %2507 = vmatpush3.msra.mxu1 %v1927_v15 }
 0x278   :  { %2479 = vmatprep.subr.mxu0 %v4141_v18  ;;  %2508 = vmatprep.subr.mxu1 %v4141_v18 }
 0x279   :  { %2480 = vmatpush3.msra.mxu0 %v2193_v41  ;;  %2509 = vmatpush3.msra.mxu1 %v1926_v7 }
 0x27a   :  { %2481 = vmatprep.subr.mxu0 %v4141_v18  ;;  %2510 = vmatprep.subr.mxu1 %v4141_v18 }
 0x27b   :  { %2482 = vmatpush3.msra.mxu0 %v2192_v35  ;;  %2511 = vmatpush3.msra.mxu1 %v1925_v24 }
 0x27c   :  { %2484 = vmatmul.mubr.f32.vlgmr.msra.gmra.mxu0 %v1475_v58  ;;  %2512 = vmatprep.subr.mxu1 %v4141_v18 }
 0x27d   :  { %2513 = vmatpush3.msra.mxu1 %v1924_v38 }
 0x27e   :  { %2514 = vmatprep.subr.mxu1 %v4141_v18 }
 0x27f   :  { %2515 = vmatpush3.msra.mxu1 %v1923_v46 }
 0x280   :  { %2516 = vmatprep.subr.mxu1 %v4141_v18 }
 0x281   :  { %2517 = vmatpush3.msra.mxu1 %v1922_v51 }
 0x2fa   :  { %v1559_v10 = vpop.f32.mrf.mxu0 }
 0x2fb   :  { %v1569_v27 = vadd.f32 %v2143_v20, %v1559_v10 }
 0x2fc   :  { %v2345_v22 = vpop.f32.mrf.mxu0 }
 0x2ff   :  { %v1653_v63 = vpop.f32.mrf.mxu1 }
 0x300   :  { %v1657_v61 = vadd.f32 %v1653_v63, %v1569_v27 }
 0x301   :  { %v2380_v1 = vpop.f32.mrf.mxu1 }
 0x31a   :  { %v1741_v26 = vpop.f32.mrf.mxu0 }
 0x31b   :  { %v1745_v12 = vadd.f32 %v1741_v26, %v1657_v61 }
 0x31c   :  { %v2415_v54 = vpop.f32.mrf.mxu0 }
 0x31f   :  { %v1829_v49 = vpop.f32.mrf.mxu1 }
 0x320   :  { %v1833_v58 = vadd.f32 %v1829_v49, %v1745_v12 }
 0x321   :  { %v2450_v57 = vpop.f32.mrf.mxu1 }
 0x33c   :  { %v1917_v53 = vpop.f32.mrf.mxu0 }
 0x33d   :  { %v1921_v18 = vadd.f32 %v1917_v53, %v1833_v58 }
 0x33e   :  { %v2485_v44 = vpop.f32.mrf.mxu0 }
 0x33f   :  { %2519 = vmatmul.mubr.f32.vlgmr.msra.gmra.mxu1 %v1921_v18 }
 0x3ff   :  { %v2011_v39 = vpop.f32.mrf.mxu1 }
 0x400   :  { %v2012_v60 = vadd.f32 %v2208_v52, %v2011_v39 }
 0x401   :  { %v2520_v4 = vpop.f32.mrf.mxu1 }
 0x402   :  { %2015 = vst [vmem:[%s4089_s9] sm:$0xff] %v2012_v60 }
 0x403   :  { %2020 = vsyncpa [#allocation3], 1 }
 0x404   :  { %2021 = vsyncpa [#allocation5], 1 }

</bundles_post_ra>
